<compile_context>
chip_gen: v6e
topology: v6e:2x2x1
jax: 0.10.0
libtpu: 0.0.40
codegen_flags: <defaults>
</compile_context>

<pallas_src>
import math

import numpy as np
import jax
import jax.numpy as jnp
from jax import lax
from jax.experimental import pallas as pl
from jax.experimental.pallas import tpu as pltpu

OUT_SIZE = 41
C_IN = 15
C_CONV = 256
H = 712                      # logical hidden size (PyTorch)
HP = 768                     # padded hidden size (6 x 128 lanes)
HP4 = 4 * HP                 # fused i/f/g/o gate width
CH = 2 * H                   # classifier hidden (1424)
CHP = 2 * HP                 # padded classifier hidden (1536 = 12 x 128)
NUM_LAYERS = 5
BN_EPS = 1e-5
TCHUNK = 16                  # in-kernel LSTM time-chunk (= time bucketing)
T_BUCKET = TCHUNK


def _pick_tiling():
    """v6e (128 MiB VMEM) gets bigger M-tiles / scoped-VMEM; v7x (64 MiB / TC)
    and v5e keep the conservative settings."""
    try:
        kind = jax.devices()[0].device_kind.lower()
    except Exception:
        kind = ""
    if "v6" in kind:
        return 512, 96 * 1024 * 1024
    return 256, 48 * 1024 * 1024


MAX_TM, VMEM_LIMIT = _pick_tiling()


# ------------------------- elementwise helpers (in-kernel) ------------------
def _erf(x):
    # Abramowitz & Stegun 7.1.26 (abs err ~1.5e-7) -- only exp/div/mul so it
    # always lowers on the VPU/EUP.  Matches torch.nn.GELU() to ~1e-7.
    a1, a2, a3, a4, a5 = 0.254829592, -0.284496736, 1.421413741, -1.453152027, 1.061405429
    p = 0.3275911
    ax = jnp.abs(x)
    t = 1.0 / (1.0 + p * ax)
    poly = ((((a5 * t + a4) * t + a3) * t + a2) * t + a1) * t
    y = 1.0 - poly * jnp.exp(-ax * ax)
    return jnp.where(x >= 0, y, -y)


def _gelu(x):
    return 0.5 * x * (1.0 + _erf(x * (1.0 / math.sqrt(2.0))))


def _sigmoid(x):
    # one EUP tanh instead of exp + divide
    return 0.5 * (jnp.tanh(0.5 * x) + 1.0)


# ------------------------------- kernels -------------------------------------
def _conv_bn_gelu_kernel(xu_ref, w_ref, b_ref, scale_ref, shift_ref, o_ref):
    y = jnp.dot(xu_ref[...].astype(jnp.bfloat16), w_ref[...],
                preferred_element_type=jnp.float32)
    y = (y + b_ref[...]) * scale_ref[...] + shift_ref[...]   # folded eval BN
    o_ref[...] = _gelu(y).astype(o_ref.dtype)


def _proj_single_kernel(x_ref, w_ref, b_ref, o_ref):
    # LSTM layer-0 input projection: x @ W_ih^T + (b_ih + b_hh), one direction
    # per grid step (weight block resident across M tiles).
    acc = jnp.dot(x_ref[...].astype(jnp.bfloat16), w_ref[0],
                  preferred_element_type=jnp.float32)
    o_ref[...] = acc + b_ref[0]


def _proj_pair_kernel(xf_ref, xb_ref, wf_ref, wb_ref, b_ref, o_ref):
    # Layers 1..4: input is [fwd | bwd] of the previous layer, passed as two
    # separate arrays so no (2,T,B,H) transpose/concat is ever materialized.
    acc = jnp.dot(xf_ref[...].astype(jnp.bfloat16), wf_ref[0],
                  preferred_element_type=jnp.float32)
    acc = acc + jnp.dot(xb_ref[...].astype(jnp.bfloat16), wb_ref[0],
                        preferred_element_type=jnp.float32)
    o_ref[...] = acc + b_ref[0]


def _lstm_chunk_kernel(xp_ref, whh_ref, mask_ref, out_ref, h_ref, c_ref):
    # grid = (direction, time_chunk); direction axis is "parallel" (v7x megacore).
    d = pl.program_id(0)
    cix = pl.program_id(1)

    @pl.when(cix == 0)
    def _():
        h_ref[...] = jnp.zeros_like(h_ref)
        c_ref[...] = jnp.zeros_like(c_ref)

    whh = whh_ref[0]                        # (HP, HP4) bf16, resident per dir

    def step(s, carry):
        # forward walks the chunk 0..TCHUNK-1, backward walks TCHUNK-1..0
        li = s + d * (TCHUNK - 1 - 2 * s)
        xp_t = xp_ref[li, :, :]             # (B, HP4) f32 gate pre-activations
        m = mask_ref[li, :, :]              # (B, 1): 1.0 where step is valid
        h_prev = h_ref[...]
        c_prev = c_ref[...]

        # single fused recurrent matmul for all 4 gates: (B,HP)bf16 @ (HP,4HP)bf16
        z = xp_t + jnp.dot(h_prev.astype(jnp.bfloat16), whh,
                           preferred_element_type=jnp.float32)

        i = _sigmoid(z[:, 0 * HP:1 * HP])   # lane-aligned gate slices
        f = _sigmoid(z[:, 1 * HP:2 * HP])
        g = jnp.tanh(z[:, 2 * HP:3 * HP])
        o = _sigmoid(z[:, 3 * HP:4 * HP])

        c_new = f * c_prev + i * g
        h_new = o * jnp.tanh(c_new)

        keep = m > 0.0                      # (B,1) bool, broadcast select
        h_ref[...] = jnp.where(keep, h_new, h_prev)
        c_ref[...] = jnp.where(keep, c_new, c_prev)
        # padded positions must stay exactly zero (pad_packed_sequence semantics)
        out_ref[0, li, :, :] = jnp.where(keep, h_new, 0.0).astype(out_ref.dtype)
        return carry

    lax.fori_loop(0, TCHUNK, step, 0, unroll=True)


def _classifier_kernel(xf_ref, xb_ref, w1f_ref, w1b_ref, b1_ref, w2_ref, b2_ref, o_ref):
    h = jnp.dot(xf_ref[...].astype(jnp.bfloat16), w1f_ref[...],
                preferred_element_type=jnp.float32)
    h = h + jnp.dot(xb_ref[...].astype(jnp.bfloat16), w1b_ref[...],
                    preferred_element_type=jnp.float32)
    h = _gelu(h + b1_ref[...])
    # TODO(synk): Dropout(0.15) is identity in eval mode.
    y = jnp.dot(h.astype(jnp.bfloat16), w2_ref[...],
                preferred_element_type=jnp.float32) + b2_ref[...]
    mx = jnp.max(y, axis=-1, keepdims=True)
    z = y - mx
    lse = jnp.log(jnp.sum(jnp.exp(z), axis=-1, keepdims=True))
    o_ref[...] = z - lse                   # LogSoftmax over lane-dense 128 cols


# ------------------------------- wrappers -------------------------------------
def _choose_tm(m):
    if m >= MAX_TM:
        return MAX_TM
    return max(8, ((m + 7) // 8) * 8)


def _pad_rows(x2d, tm):
    m = x2d.shape[0]
    mp = ((m + tm - 1) // tm) * tm
    if mp != m:
        x2d = jnp.pad(x2d, ((0, mp - m), (0, 0)))
    return x2d, mp


def conv_bn_gelu(x_tm, p):
    """x_tm: (T, B, Cin) time-major -> (T, B, 256) bf16."""
    T, B, Cin = x_tm.shape
    Cout = C_CONV
    xpad = jnp.pad(x_tm, ((1, 1), (0, 0), (0, 0)))
    # TODO(synk): an in-kernel shifted-window conv (3 dots over an overlapping
    # time block) would avoid materializing the 3x unfolded input in HBM; the
    # unfold is kept (in the input dtype -- bf16 for conv2) for simplicity.
    xu = jnp.concatenate([xpad[0:T], xpad[1:T + 1], xpad[2:T + 2]], axis=-1)
    xu2d = xu.reshape(T * B, 3 * Cin)
    M = T * B
    tm = _choose_tm(M)
    xu2d, Mp = _pad_rows(xu2d, tm)
    out = pl.pallas_call(
        _conv_bn_gelu_kernel,
        out_shape=jax.ShapeDtypeStruct((Mp, Cout), jnp.bfloat16),
        grid_spec=pltpu.PrefetchScalarGridSpec(
            num_scalar_prefetch=0,
            grid=(Mp // tm,),
            in_specs=[
                pl.BlockSpec((tm, 3 * Cin), lambda m: (m, 0)),
                pl.BlockSpec((3 * Cin, Cout), lambda m: (0, 0)),
                pl.BlockSpec((1, Cout), lambda m: (0, 0)),
                pl.BlockSpec((1, Cout), lambda m: (0, 0)),
                pl.BlockSpec((1, Cout), lambda m: (0, 0)),
            ],
            out_specs=pl.BlockSpec((tm, Cout), lambda m: (m, 0)),
        ),
        compiler_params=pltpu.CompilerParams(
            dimension_semantics=("parallel",), vmem_limit_bytes=VMEM_LIMIT),
    )(xu2d, p["wmat"], p["b"], p["scale"], p["shift"])
    return out[:M].reshape(T, B, Cout)


def lstm_input_proj_single(x2d, wih, bias, T, B):
    """Layer-0 input projection for both directions: -> (T, B, 2*4HP) f32."""
    M = T * B
    F = x2d.shape[1]
    tm = _choose_tm(M)
    x2d, Mp = _pad_rows(x2d, tm)
    out = pl.pallas_call(
        _proj_single_kernel,
        out_shape=jax.ShapeDtypeStruct((Mp, 2 * HP4), jnp.float32),
        grid_spec=pltpu.PrefetchScalarGridSpec(
            num_scalar_prefetch=0,
            grid=(2, Mp // tm),
            in_specs=[
                pl.BlockSpec((tm, F), lambda d, m: (m, 0)),
                pl.BlockSpec((1, F, HP4), lambda d, m: (d, 0, 0)),
                pl.BlockSpec((1, 1, HP4), lambda d, m: (d, 0, 0)),
            ],
            out_specs=pl.BlockSpec((tm, HP4), lambda d, m: (m, d)),
        ),
        compiler_params=pltpu.CompilerParams(
            dimension_semantics=("parallel", "parallel"),
            vmem_limit_bytes=VMEM_LIMIT),
    )(x2d, wih, bias)
    return out[:M].reshape(T, B, 2 * HP4)


def lstm_input_proj_pair(xf2d, xb2d, wtop, wbot, bias, T, B):
    """Layers 1..4 input projection for both directions: -> (T, B, 2*4HP) f32."""
    M = T * B
    tm = _choose_tm(M)
    xf2d, Mp = _pad_rows(xf2d, tm)
    xb2d, _ = _pad_rows(xb2d, tm)
    # TODO(synk): storing this projection output in bf16 would halve the single
    # largest HBM stream but rounds gate pre-activations; kept f32 for parity.
    out = pl.pallas_call(
        _proj_pair_kernel,
        out_shape=jax.ShapeDtypeStruct((Mp, 2 * HP4), jnp.float32),
        grid_spec=pltpu.PrefetchScalarGridSpec(
            num_scalar_prefetch=0,
            grid=(2, Mp // tm),
            in_specs=[
                pl.BlockSpec((tm, HP), lambda d, m: (m, 0)),
                pl.BlockSpec((tm, HP), lambda d, m: (m, 0)),
                pl.BlockSpec((1, HP, HP4), lambda d, m: (d, 0, 0)),
                pl.BlockSpec((1, HP, HP4), lambda d, m: (d, 0, 0)),
                pl.BlockSpec((1, 1, HP4), lambda d, m: (d, 0, 0)),
            ],
            out_specs=pl.BlockSpec((tm, HP4), lambda d, m: (m, d)),
        ),
        compiler_params=pltpu.CompilerParams(
            dimension_semantics=("parallel", "parallel"),
            vmem_limit_bytes=VMEM_LIMIT),
    )(xf2d, xb2d, wtop, wbot, bias)
    return out[:M].reshape(T, B, 2 * HP4)


def bilstm_layer(xp, whh, mask, T, B):
    """Both directions of one bi-LSTM layer; grid=(2, T/TCHUNK), in-kernel
    unrolled time loop over TCHUNK steps, h/c in VMEM scratch, bf16 output."""
    NC = T // TCHUNK
    # TODO(synk): on v7x, pipeline_mode=pl.Buffered(1) on the resident whh slab
    # would free ~4.5 MiB of VMEM; omitted here to keep the build portable.
    return pl.pallas_call(
        _lstm_chunk_kernel,
        out_shape=jax.ShapeDtypeStruct((2, T, B, HP), jnp.bfloat16),
        grid_spec=pltpu.PrefetchScalarGridSpec(
            num_scalar_prefetch=0,
            grid=(2, NC),
            in_specs=[
                # forward consumes chunk c, backward consumes chunk NC-1-c; the
                # direction index also selects this direction's 4HP gate columns.
                pl.BlockSpec((TCHUNK, B, HP4),
                             lambda d, c: (c + d * (NC - 1 - 2 * c), 0, d)),
                pl.BlockSpec((1, HP, HP4), lambda d, c: (d, 0, 0)),
                pl.BlockSpec((TCHUNK, B, 1),
                             lambda d, c: (c + d * (NC - 1 - 2 * c), 0, 0)),
            ],
            out_specs=pl.BlockSpec(
                (1, TCHUNK, B, HP),
                lambda d, c: (d, c + d * (NC - 1 - 2 * c), 0, 0)),
            scratch_shapes=[pltpu.VMEM((B, HP), jnp.float32),   # h
                            pltpu.VMEM((B, HP), jnp.float32)],  # c
        ),
        compiler_params=pltpu.CompilerParams(
            dimension_semantics=("parallel", "arbitrary"),
            vmem_limit_bytes=VMEM_LIMIT),
    )(xp, whh, mask)


def classifier(xf2d, xb2d, cp, T, B):
    M = T * B
    tm = _choose_tm(M)
    xf2d, Mp = _pad_rows(xf2d, tm)
    xb2d, _ = _pad_rows(xb2d, tm)
    out = pl.pallas_call(
        _classifier_kernel,
        out_shape=jax.ShapeDtypeStruct((Mp, 128), jnp.float32),
        grid_spec=pltpu.PrefetchScalarGridSpec(
            num_scalar_prefetch=0,
            grid=(Mp // tm,),
            in_specs=[
                pl.BlockSpec((tm, HP), lambda m: (m, 0)),
                pl.BlockSpec((tm, HP), lambda m: (m, 0)),
                pl.BlockSpec((HP, CHP), lambda m: (0, 0)),
                pl.BlockSpec((HP, CHP), lambda m: (0, 0)),
                pl.BlockSpec((1, CHP), lambda m: (0, 0)),
                pl.BlockSpec((CHP, 128), lambda m: (0, 0)),
                pl.BlockSpec((1, 128), lambda m: (0, 0)),
            ],
            out_specs=pl.BlockSpec((tm, 128), lambda m: (m, 0)),
        ),
        compiler_params=pltpu.CompilerParams(
            dimension_semantics=("parallel",), vmem_limit_bytes=VMEM_LIMIT),
    )(xf2d, xb2d, cp["w1f"], cp["w1b"], cp["b1"], cp["w2"], cp["b2"])
    return out[:M]


# ------------------------------- forward --------------------------------------
def new_network_forward(dp, x, lx):
    """x: (B, T_in, 15) f32 zero-padded batch; lx: per-sequence lengths (host ints)."""
    B_orig, T_in, _ = x.shape
    lx = np.asarray(lx)
    T_real = int(lx.max())
    T_run = int(-(-T_real // T_BUCKET) * T_BUCKET)        # bucketed max length

    # pad batch to a multiple of 8 (sublane / MXU rows); padded rows have len 0
    B = ((B_orig + 7) // 8) * 8
    if B != B_orig:
        x = jnp.pad(x, ((0, B - B_orig), (0, 0), (0, 0)))
        lx_pad = np.concatenate([lx, np.zeros(B - B_orig, dtype=lx.dtype)])
    else:
        lx_pad = lx

    # time-major; truncate / zero-pad time to the bucketed max length up front
    # (valid frames t < T_real only depend on x[0..T_real], which is preserved)
    x_tm = jnp.transpose(x, (1, 0, 2))                    # (T_in, B, 15)
    if T_in >= T_run:
        x_tm = x_tm[:T_run]
    else:
        x_tm = jnp.pad(x_tm, ((0, T_run - T_in), (0, 0), (0, 0)))

    h = conv_bn_gelu(x_tm, dp["conv1"])
    h = conv_bn_gelu(h, dp["conv2"])                      # (T_run, B, 256) bf16

    # pack_padded_sequence: mask the recurrence per sequence length
    mask = jnp.asarray(
        (np.arange(T_run)[:, None] < lx_pad[None, :]).astype(np.float32)[..., None])

    x0_2d = h.reshape(T_run * B, C_CONV)
    out_f2d = out_b2d = None
    for layer in range(NUM_LAYERS):
        lp = dp["lstm"][layer]
        if layer == 0:
            xp = lstm_input_proj_single(x0_2d, lp["wih"], lp["bias"], T_run, B)
        else:
            xp = lstm_input_proj_pair(out_f2d, out_b2d, lp["wih_top"],
                                      lp["wih_bot"], lp["bias"], T_run, B)
        out = bilstm_layer(xp, lp["whh"], mask, T_run, B)   # (2, T_run, B, HP) bf16
        out_f2d = out[0].reshape(T_run * B, HP)
        out_b2d = out[1].reshape(T_run * B, HP)
        # TODO(synk): inter-layer LSTM dropout (p=0.15) is a no-op in eval mode.

    logp = classifier(out_f2d, out_b2d, dp["cls"], T_run, B)     # (T_run*B, 128)
    logp = jnp.transpose(logp.reshape(T_run, B, 128), (1, 0, 2))
    logp = logp[:B_orig, :T_real, :OUT_SIZE]
    out_length = jnp.asarray(lx, dtype=jnp.int32)
    return logp, out_length


# --------------------------- deterministic params ----------------------------
def init_params(key):
    """PyTorch-layout parameters (same tensor shapes as the nn.Module)."""
    keys = iter(jax.random.split(key, 128))

    def nrm(shape, scale=0.05):
        return scale * jax.random.normal(next(keys), shape, dtype=jnp.float32)

    def conv_block(cin, cout):
        return dict(w=nrm((cout, cin, 3)), b=nrm((cout,)),
                    gamma=1.0 + nrm((cout,)), beta=nrm((cout,)),
                    mean=nrm((cout,)), var=1.0 + jnp.abs(nrm((cout,))))

    params = {"conv1": conv_block(C_IN, C_CONV), "conv2": conv_block(C_CONV, C_CONV)}

    k_lstm = 1.0 / math.sqrt(H)
    lstm = []
    for layer in range(NUM_LAYERS):
        in_size = C_CONV if layer == 0 else 2 * H
        lp = {}
        for tag in ("f", "b"):
            lp["w_ih_" + tag] = nrm((4 * H, in_size), k_lstm)
            lp["w_hh_" + tag] = nrm((4 * H, H), k_lstm)
            lp["b_ih_" + tag] = nrm((4 * H,), k_lstm)
            lp["b_hh_" + tag] = nrm((4 * H,), k_lstm)
        lstm.append(lp)
    params["lstm"] = lstm

    params["cls"] = dict(w1=nrm((CH, CH), 0.02), b1=nrm((CH,), 0.02),
                         w2=nrm((OUT_SIZE, CH), 0.02), b2=nrm((OUT_SIZE,), 0.02))
    return params


def prepare_params(params):
    """One-time conversion to device layouts: transposed, gate-packed, padded
    to HP=768 / CHP=1536 lanes, bf16 weights, folded BN scale/shift."""
    dp = {}

    def conv_prep(p):
        wmat = jnp.transpose(p["w"], (2, 1, 0)).reshape(-1, C_CONV)   # [k*Cin+ci, co]
        scale = p["gamma"] / jnp.sqrt(p["var"] + BN_EPS)
        shift = p["beta"] - p["mean"] * scale
        return dict(wmat=wmat.astype(jnp.bfloat16), b=p["b"].reshape(1, C_CONV),
                    scale=scale.reshape(1, C_CONV), shift=shift.reshape(1, C_CONV))

    dp["conv1"] = conv_prep(params["conv1"])
    dp["conv2"] = conv_prep(params["conv2"])

    def pack_gate_cols(w, in_pad):
        # (4H, F) gate-major rows -> (in_pad, 4*HP), per-gate columns padded.
        fin = w.shape[1]
        wg = jnp.transpose(w.reshape(4, H, fin), (2, 0, 1))            # (F, 4, H)
        wg = jnp.pad(wg, ((0, in_pad - fin), (0, 0), (0, HP - H)))
        return wg.reshape(in_pad, HP4)

    def pack_gate_bias(b):
        return jnp.pad(b.reshape(4, H), ((0, 0), (0, HP - H))).reshape(HP4)

    lstm_dev = []
    for layer, lp in enumerate(params["lstm"]):
        whh = jnp.stack([pack_gate_cols(lp["w_hh_f"], HP),
                         pack_gate_cols(lp["w_hh_b"], HP)]).astype(jnp.bfloat16)
        bias = jnp.stack([pack_gate_bias(lp["b_ih_f"] + lp["b_hh_f"]),
                          pack_gate_bias(lp["b_ih_b"] + lp["b_hh_b"])]).reshape(2, 1, HP4)
        dlp = dict(whh=whh, bias=bias)
        if layer == 0:
            dlp["wih"] = jnp.stack([pack_gate_cols(lp["w_ih_f"], C_CONV),
                                    pack_gate_cols(lp["w_ih_b"], C_CONV)]).astype(jnp.bfloat16)
        else:
            dlp["wih_top"] = jnp.stack([pack_gate_cols(lp["w_ih_f"][:, :H], HP),
                                        pack_gate_cols(lp["w_ih_b"][:, :H], HP)]).astype(jnp.bfloat16)
            dlp["wih_bot"] = jnp.stack([pack_gate_cols(lp["w_ih_f"][:, H:], HP),
                                        pack_gate_cols(lp["w_ih_b"][:, H:], HP)]).astype(jnp.bfloat16)
        lstm_dev.append(dlp)
    dp["lstm"] = lstm_dev

    cls = params["cls"]
    w1f = jnp.pad(jnp.transpose(cls["w1"][:, :H]), ((0, HP - H), (0, CHP - CH)))
    w1b = jnp.pad(jnp.transpose(cls["w1"][:, H:]), ((0, HP - H), (0, CHP - CH)))
    b1 = jnp.pad(cls["b1"], (0, CHP - CH)).reshape(1, CHP)
    w2 = jnp.pad(jnp.transpose(cls["w2"]), ((0, CHP - CH), (0, 128 - OUT_SIZE)))
    b2 = jnp.concatenate([cls["b2"],
                          jnp.full((128 - OUT_SIZE,), -1e30, jnp.float32)]).reshape(1, 128)
    dp["cls"] = dict(w1f=w1f.astype(jnp.bfloat16), w1b=w1b.astype(jnp.bfloat16),
                     b1=b1, w2=w2.astype(jnp.bfloat16), b2=b2)
    return dp


if __name__ == "__main__":
    key = jax.random.PRNGKey(0)
    pkey, xkey = jax.random.split(key)
    params = init_params(pkey)
    dev_params = prepare_params(params)

    B, T_in = 2, 12
    x = jax.random.normal(xkey, (B, T_in, C_IN), dtype=jnp.float32)
    lx = np.array([12, 9], dtype=np.int32)
    # emulate pad_sequence: zero the padded tail of each sequence
    valid = (np.arange(T_in)[None, :, None] < lx[:, None, None]).astype(np.float32)
    x = x * jnp.asarray(valid)

    out, out_len = new_network_forward(dev_params, x, lx)
    out = jax.block_until_ready(out)
    out_len = jax.block_until_ready(out_len)

    assert out.shape == (B, int(lx.max()), OUT_SIZE), out.shape
    assert out_len.shape == (B,)
    # log-softmax rows must be valid log-probabilities
    probs = jnp.exp(out).sum(axis=-1)
    assert bool(jnp.allclose(probs, 1.0, atol=1e-3)), probs
    print("KERNEL_OK")
</pallas_src>

<mosaic_0001>
module attributes {stable_mosaic.version = 11 : i64} {
  func.func @_conv_bn_gelu_kernel(%arg0: i32, %arg1: memref<128x45xf32, #tpu.memory_space<vmem>>, %arg2: memref<45x256xbf16, #tpu.memory_space<vmem>>, %arg3: memref<1x256xf32, #tpu.memory_space<vmem>>, %arg4: memref<1x256xf32, #tpu.memory_space<vmem>>, %arg5: memref<1x256xf32, #tpu.memory_space<vmem>>, %arg6: memref<128x256xbf16, #tpu.memory_space<vmem>>) attributes {dimension_semantics = [#tpu.dimension_semantics<parallel>], iteration_bounds = array<i64: 1>, scalar_prefetch = 0 : i64, scratch_operands = 0 : i64, tpu.core_type = #tpu.core_type<tc>, window_params = [{transform_indices = @transform_0, window_bounds = array<i64: 128, 45>}, {pipeline_mode = #tpu.pipeline_mode<synchronous>, transform_indices = @transform_1, window_bounds = array<i64: 45, 256>}, {pipeline_mode = #tpu.pipeline_mode<synchronous>, transform_indices = @transform_2, window_bounds = array<i64: 1, 256>}, {pipeline_mode = #tpu.pipeline_mode<synchronous>, transform_indices = @transform_3, window_bounds = array<i64: 1, 256>}, {pipeline_mode = #tpu.pipeline_mode<synchronous>, transform_indices = @transform_4, window_bounds = array<i64: 1, 256>}, {transform_indices = @transform_5, window_bounds = array<i64: 128, 256>}]} {
    %c0 = arith.constant 0 : index
    %c0_0 = arith.constant 0 : index
    %0 = vector.load %arg1[%c0, %c0_0] : memref<128x45xf32, #tpu.memory_space<vmem>>, vector<128x45xf32>
    %1 = arith.truncf %0 : vector<128x45xf32> to vector<128x45xbf16>
    %c0_1 = arith.constant 0 : index
    %c0_2 = arith.constant 0 : index
    %2 = vector.load %arg2[%c0_1, %c0_2] : memref<45x256xbf16, #tpu.memory_space<vmem>>, vector<45x256xbf16>
    %cst = arith.constant dense<0.000000e+00> : vector<128x256xf32>
    %3 = tpu.matmul %1, %2, %cst {dimension_numbers = #tpu.dot_dimension_numbers<[1], [0], [0], [1], [0, 0, 1, 1], [], []>} : vector<128x45xbf16>, vector<45x256xbf16>, vector<128x256xf32> -> vector<128x256xf32>
    %c0_3 = arith.constant 0 : index
    %c0_4 = arith.constant 0 : index
    %4 = vector.load %arg3[%c0_3, %c0_4] : memref<1x256xf32, #tpu.memory_space<vmem>>, vector<1x256xf32>
    %5 = vector.broadcast %4 : vector<1x256xf32> to vector<128x256xf32>
    %6 = arith.addf %3, %5 : vector<128x256xf32>
    %c0_5 = arith.constant 0 : index
    %c0_6 = arith.constant 0 : index
    %7 = vector.load %arg4[%c0_5, %c0_6] : memref<1x256xf32, #tpu.memory_space<vmem>>, vector<1x256xf32>
    %8 = vector.broadcast %7 : vector<1x256xf32> to vector<128x256xf32>
    %9 = arith.mulf %6, %8 : vector<128x256xf32>
    %c0_7 = arith.constant 0 : index
    %c0_8 = arith.constant 0 : index
    %10 = vector.load %arg5[%c0_7, %c0_8] : memref<1x256xf32, #tpu.memory_space<vmem>>, vector<1x256xf32>
    %11 = vector.broadcast %10 : vector<1x256xf32> to vector<128x256xf32>
    %12 = arith.addf %9, %11 : vector<128x256xf32>
    %cst_9 = arith.constant 5.000000e-01 : f32
    %13 = vector.broadcast %cst_9 : f32 to vector<128x256xf32>
    %14 = arith.mulf %13, %12 : vector<128x256xf32>
    %cst_10 = arith.constant 0.707106769 : f32
    %15 = vector.broadcast %cst_10 : f32 to vector<128x256xf32>
    %16 = arith.mulf %12, %15 : vector<128x256xf32>
    %17 = math.absf %16 : vector<128x256xf32>
    %cst_11 = arith.constant 0.327591091 : f32
    %18 = vector.broadcast %cst_11 : f32 to vector<128x256xf32>
    %19 = arith.mulf %18, %17 : vector<128x256xf32>
    %cst_12 = arith.constant 1.000000e+00 : f32
    %20 = vector.broadcast %cst_12 : f32 to vector<128x256xf32>
    %21 = arith.addf %20, %19 : vector<128x256xf32>
    %cst_13 = arith.constant 1.000000e+00 : f32
    %22 = vector.broadcast %cst_13 : f32 to vector<128x256xf32>
    %23 = arith.divf %22, %21 : vector<128x256xf32>
    %cst_14 = arith.constant 1.06140542 : f32
    %24 = vector.broadcast %cst_14 : f32 to vector<128x256xf32>
    %25 = arith.mulf %24, %23 : vector<128x256xf32>
    %cst_15 = arith.constant -1.45315206 : f32
    %26 = vector.broadcast %cst_15 : f32 to vector<128x256xf32>
    %27 = arith.addf %25, %26 : vector<128x256xf32>
    %28 = arith.mulf %27, %23 : vector<128x256xf32>
    %cst_16 = arith.constant 1.42141378 : f32
    %29 = vector.broadcast %cst_16 : f32 to vector<128x256xf32>
    %30 = arith.addf %28, %29 : vector<128x256xf32>
    %31 = arith.mulf %30, %23 : vector<128x256xf32>
    %cst_17 = arith.constant -0.284496725 : f32
    %32 = vector.broadcast %cst_17 : f32 to vector<128x256xf32>
    %33 = arith.addf %31, %32 : vector<128x256xf32>
    %34 = arith.mulf %33, %23 : vector<128x256xf32>
    %cst_18 = arith.constant 0.254829586 : f32
    %35 = vector.broadcast %cst_18 : f32 to vector<128x256xf32>
    %36 = arith.addf %34, %35 : vector<128x256xf32>
    %37 = arith.mulf %36, %23 : vector<128x256xf32>
    %cst_19 = arith.constant 0.000000e+00 : f32
    %38 = vector.broadcast %cst_19 : f32 to vector<128x256xf32>
    %39 = arith.subf %38, %17 : vector<128x256xf32>
    %40 = arith.mulf %39, %17 : vector<128x256xf32>
    %41 = math.exp %40 : vector<128x256xf32>
    %42 = arith.mulf %37, %41 : vector<128x256xf32>
    %cst_20 = arith.constant 1.000000e+00 : f32
    %43 = vector.broadcast %cst_20 : f32 to vector<128x256xf32>
    %44 = arith.subf %43, %42 : vector<128x256xf32>
    %cst_21 = arith.constant 0.000000e+00 : f32
    %45 = vector.broadcast %cst_21 : f32 to vector<128x256xf32>
    %46 = arith.cmpf oge, %16, %45 : vector<128x256xf32>
    %cst_22 = arith.constant 0.000000e+00 : f32
    %47 = vector.broadcast %cst_22 : f32 to vector<128x256xf32>
    %48 = arith.subf %47, %44 : vector<128x256xf32>
    %49 = arith.select %46, %44, %48 : vector<128x256xi1>, vector<128x256xf32>
    %cst_23 = arith.constant 1.000000e+00 : f32
    %50 = vector.broadcast %cst_23 : f32 to vector<128x256xf32>
    %51 = arith.addf %50, %49 : vector<128x256xf32>
    %52 = arith.mulf %14, %51 : vector<128x256xf32>
    %53 = arith.truncf %52 : vector<128x256xf32> to vector<128x256xbf16>
    %c0_24 = arith.constant 0 : index
    %c0_25 = arith.constant 0 : index
    %54 = vector.load %arg6[%c0_24, %c0_25] : memref<128x256xbf16, #tpu.memory_space<vmem>>, vector<128x256xbf16>
    tpu.vector_store %arg6[%c0_24, %c0_25], %53 {strides = array<i32>} : memref<128x256xbf16, #tpu.memory_space<vmem>>, vector<128x256xbf16>,
    return
  }
  func.func @transform_0(%arg0: i32) -> (i32, i32) {
    %c0_i32 = arith.constant 0 : i32
    %c0_i32_0 = arith.constant 0 : i32
    return %arg0, %c0_i32 : i32, i32
  }
  func.func @transform_1(%arg0: i32) -> (i32, i32) {
    %c0_i32 = arith.constant 0 : i32
    %c0_i32_0 = arith.constant 0 : i32
    %c0_i32_1 = arith.constant 0 : i32
    return %c0_i32, %c0_i32_0 : i32, i32
  }
  func.func @transform_2(%arg0: i32) -> (i32, i32) {
    %c0_i32 = arith.constant 0 : i32
    %c0_i32_0 = arith.constant 0 : i32
    %c0_i32_1 = arith.constant 0 : i32
    return %c0_i32, %c0_i32_0 : i32, i32
  }
  func.func @transform_3(%arg0: i32) -> (i32, i32) {
    %c0_i32 = arith.constant 0 : i32
    %c0_i32_0 = arith.constant 0 : i32
    %c0_i32_1 = arith.constant 0 : i32
    return %c0_i32, %c0_i32_0 : i32, i32
  }
  func.func @transform_4(%arg0: i32) -> (i32, i32) {
    %c0_i32 = arith.constant 0 : i32
    %c0_i32_0 = arith.constant 0 : i32
    %c0_i32_1 = arith.constant 0 : i32
    return %c0_i32, %c0_i32_0 : i32, i32
  }
  func.func @transform_5(%arg0: i32) -> (i32, i32) {
    %c0_i32 = arith.constant 0 : i32
    %c0_i32_0 = arith.constant 0 : i32
    return %arg0, %c0_i32 : i32, i32
  }
}

</mosaic_0001>

<bundles_post_ra>
// kernel: tpu_custom_call.1
= control target key start
LH: loop header
LB: loop body
LE: loop exit
PB: predicated region body
PF: predicated region fallthrough
CT: control target
= control target key end

     0   :  { %vm117_vm0 = vcmask 1045504   ;;  %vm118_vm1 = vcmask 1046528   ;;  %v1536_v2 = vmov 65535   ;;  %v1537_v5 = vmov 0   ;;  %s2388_s0 = inlined_call_operand.vmem [shape: f32[128,45], index: 0, kind: input, shape index: {}]   ;;  %s2389_s1 = inlined_call_operand.vmem [shape: bf16[45,256], index: 1, kind: input, shape index: {}]   ;;  %s2390_s2 = inlined_call_operand.vmem [shape: f32[1,256], index: 2, kind: input, shape index: {}]   ;;  %s2391_s3 = inlined_call_operand.vmem [shape: f32[1,256], index: 3, kind: input, shape index: {}]   ;;  %s2392_s4 = inlined_call_operand.vmem [shape: f32[1,256], index: 4, kind: input, shape index: {}]   ;;  %s2393_s5 = inlined_call_operand.hbm [shape: bf16[128,256], index: 5, kind: output, shape index: {}]  }
   0x1   :  { %v1377_v0 = vld [vmem:[%s2389_s1 + $0x24] ss:$8 sps:$4 sm:$0x7f]   ;;  %v1379_v1 = vld [vmem:[%s2389_s1 + $0x20] ss:$8 sps:$4 sm:$0x7f]   ;;  %159 = vmatprep.mubr.bf16.mxu0 %v1537_v5  ;;  %199 = vmatprep.mubr.bf16.mxu1 %v1537_v5 }
   0x2   :  { %v119_v3 = vsel %vm117_vm0, 4294967295, %v1536_v2  ;;  %v1380_v8 = vld [vmem:[%s2389_s1 + $0x14] ss:$8 sps:$4 sm:$0xff]   ;;  %v1382_v9 = vld [vmem:[%s2389_s1 + $0x10] ss:$8 sps:$4 sm:$0xff]   ;;  %v22_v12 = vld [vmem:[%s2388_s0] sm:$0xff] }
   0x3   :  { %v120_v4 = vsel %vm118_vm1, %v119_v3, 0  ;;  %v1383_v10 = vld [vmem:[%s2389_s1 + $0x4] ss:$8 sps:$4 sm:$0xff]   ;;  %v1385_v11 = vld [vmem:[%s2389_s1] ss:$8 sps:$4 sm:$0xff]  }
   0x4   :  { %v125_v6 = vand.u32 %v1377_v0, %v120_v4  ;;  %v122_v7 = vand.u32 %v1379_v1, %v120_v4 }
   0x6   :  { %137 = vmatprep.subr.bf16.mxu0 %v125_v6  ;;  %1366 = vmatprep.subr.bf16.mxu1 %v125_v6 }
   0x7   :  { %138 = vmatpush1.bf16.msra.mxu0 %v122_v7  ;;  %1369 = vmatpush1.bf16.msra.mxu1 %v122_v7 }
   0x8   :  { %139 = vmatprep.subr.bf16.mxu0 %v1380_v8  ;;  %1367 = vmatprep.subr.bf16.mxu1 %v1380_v8 }
   0x9   :  { %10 = vsyncpa [#allocation3], 0  ;;  %v23_v13 = vld [vmem:[%s2388_s0 + $0x8] sm:$0xff]  ;;  %v30_v14 = vld [vmem:[%s2388_s0 + $0x40] sm:$0xff]  ;;  %vm92_vm2 = vcmask 367616   ;;  %v54_v36 = vlaneseq }
   0xa   :  { %v31_v15 = vld [vmem:[%s2388_s0 + $0x48] sm:$0xff]  ;;  %v38_v16 = vpack.c.bf16 %v23_v13, %v22_v12  ;;  %v24_v18 = vld [vmem:[%s2388_s0 + $0x10] sm:$0xff]  ;;  %v25_v19 = vld [vmem:[%s2388_s0 + $0x18] sm:$0xff] }
   0xb   :  { %140 = vmatpush1.bf16.msra.mxu0 %v1382_v9  ;;  %1370 = vmatpush1.bf16.msra.mxu1 %v1382_v9  ;;  %v42_v17 = vpack.c.bf16 %v31_v15, %v30_v14  ;;  %v32_v20 = vld [vmem:[%s2388_s0 + $0x50] sm:$0xff]  ;;  %v33_v21 = vld [vmem:[%s2388_s0 + $0x58] sm:$0xff]  ;;  %v39_v22 = vpack.c.bf16 %v25_v19, %v24_v18  ;;  %v26_v24 = vld [vmem:[%s2388_s0 + $0x20] sm:$0xff]  ;;  %v55_v37 = vshrl.u32 %v54_v36, 7 }
   0xc   :  { %141 = vmatprep.subr.bf16.mxu0 %v1383_v10  ;;  %1368 = vmatprep.subr.bf16.mxu1 %v1383_v10  ;;  %v43_v23 = vpack.c.bf16 %v33_v21, %v32_v20  ;;  %v27_v25 = vld [vmem:[%s2388_s0 + $0x28] sm:$0xff]  ;;  %v34_v26 = vld [vmem:[%s2388_s0 + $0x60] sm:$0xff]  ;;  %v28_v30 = vld [vmem:[%s2388_s0 + $0x30] sm:$0xff] }
   0xd   :  { %v35_v27 = vld [vmem:[%s2388_s0 + $0x68] sm:$0xff]  ;;  %v40_v28 = vpack.c.bf16 %v27_v25, %v26_v24  ;;  %v29_v31 = vld [vmem:[%s2388_s0 + $0x38] sm:$0xff]  ;;  %v36_v32 = vld [vmem:[%s2388_s0 + $0x70] sm:$0xff]  ;;  %v56_v38 = vsub.s32 0, %v55_v37  ;;  %v60_v40 = vsub.s32 1, %v55_v37 }
   0xe   :  { %v44_v29 = vpack.c.bf16 %v35_v27, %v34_v26  ;;  %v37_v33 = vld [vmem:[%s2388_s0 + $0x78] sm:$0xff]  ;;  %v41_v34 = vpack.c.bf16 %v29_v31, %v28_v30  ;;  %v52_v39 = vld [vmem:[%s2390_s2] sm:$0x3]  ;;  %s1538_s2 = smov [#allocation2]  }
   0xf   :  { %142 = vmatpush1.bf16.msra.mxu0 %v1385_v11  ;;  %1371 = vmatpush1.bf16.msra.mxu1 %v1385_v11  ;;  %v45_v35 = vpack.c.bf16 %v37_v33, %v36_v32  ;;  %v240_v41 = vld [vmem:[%s2391_s3] sm:$0x3]  ;;  %v1651_v42 = vrot.slane %v52_v39, %v56_v38  ;;  %v1658_v45 = vrot.slane %v52_v39, %v60_v40  ;;  %s1309_s3 = sshll.u32 %s1538_s2, 4  ;;  %s1310_s3 = int_to_ptr.vmem [resolvable:$true] %s1309_s3 }
  0x10   :  { %v284_v43 = vld [vmem:[%s2392_s4] sm:$0x3]  ;;  %v1656_v44 = vrot.slane %v240_v41, %v56_v38  ;;  %v1664_v51 = vrot.slane %v240_v41, %v60_v40  ;;  %s1514_s4 = scalar_lea.vmem %s1310_s3, 2048  ;;  %p1519_p1 = scmp.lt.s32.totalorder %s1310_s3, %s1310_s3 }
  0x11   :  { %v1661_v49 = vrot.slane %v284_v43, %v56_v38  ;;  %v1670_v58 = vrot.slane %v284_v43, %v60_v40  ;;  %p1515_p0 = scmp.ne.s32.totalorder %s1310_s3, %s1514_s4  ;;  %p1520_p2 = scmp.lt.s32.totalorder %s1514_s4, %s1514_s4 }
  0x12   :  { %1326 = vmatmul.mubr.msk.bf16.vlgmr.msra.gmra.mxu0 %vm92_vm2, %v38_v16  ;;  %1330 = vmatmul.mubr.msk.bf16.vlgmr.msra.gmra.mxu1 %vm92_vm2, %v42_v17 }
  0x13   :  { %169 = vmatprep.mubr.bf16.mxu0 %v1537_v5  ;;  %209 = vmatprep.mubr.bf16.mxu1 %v1537_v5  ;;  %p1521_p3 = por %p1520_p2, %p1519_p1 }
  0x15   :  { %p1522_p4 = pnand %p1521_p3, %p1515_p0 }
  0x1a   :  { %1327 = vmatmul.mubr.msk.bf16.gmra.mxu0 %vm92_vm2, %v39_v22  ;;  %1331 = vmatmul.mubr.msk.bf16.gmra.mxu1 %vm92_vm2, %v43_v23 }
  0x1b   :  { %179 = vmatprep.mubr.bf16.mxu0 %v1537_v5  ;;  %219 = vmatprep.mubr.bf16.mxu1 %v1537_v5 }
  0x22   :  { %1328 = vmatmul.mubr.msk.bf16.gmra.mxu0 %vm92_vm2, %v40_v28  ;;  %1332 = vmatmul.mubr.msk.bf16.gmra.mxu1 %vm92_vm2, %v44_v29 }
  0x23   :  { %189 = vmatprep.mubr.bf16.mxu0 %v1537_v5  ;;  %229 = vmatprep.mubr.bf16.mxu1 %v1537_v5 }
  0x2a   :  { %1329 = vmatmul.mubr.msk.bf16.gmra.mxu0 %vm92_vm2, %v41_v34  ;;  %1333 = vmatmul.mubr.msk.bf16.gmra.mxu1 %vm92_vm2, %v45_v35 }
  0xd2   :  { %v161_v46 = vpop.f32.mrf.mxu0  ;;  %v201_v47 = vpop.f32.mrf.mxu1 }
  0xd3   :  { %v162_v48 = vadd.f32 %v161_v46, %v1651_v42  ;;  %v202_v50 = vadd.f32 %v201_v47, %v1651_v42 }
  0xd4   :  { %v163_v52 = vpop.f32.mrf.mxu0  ;;  %v203_v53 = vpop.f32.mrf.mxu1 }
  0xd5   :  { %v252_v54 = vmul.f32 %v1656_v44, %v162_v48  ;;  %v268_v55 = vmul.f32 %v1656_v44, %v202_v50  ;;  %v164_v56 = vadd.f32 %v163_v52, %v1658_v45  ;;  %v204_v57 = vadd.f32 %v203_v53, %v1658_v45 }
  0xd6   :  { %v165_v59 = vpop.f32.mrf.mxu0  ;;  %v205_v3 = vpop.f32.mrf.mxu1 }
  0xd7   :  { %v296_v60 = vadd.f32 %v1661_v49, %v252_v54  ;;  %v312_v61 = vadd.f32 %v1661_v49, %v268_v55  ;;  %v253_v62 = vmul.f32 %v1664_v51, %v164_v56  ;;  %v269_v63 = vmul.f32 %v1664_v51, %v204_v57 }
  0xd8   :  { %v166_v2 = vadd.f32 %v165_v59, %v1651_v42  ;;  %v206_v10 = vadd.f32 %v205_v3, %v1651_v42  ;;  %v167_v25 = vpop.f32.mrf.mxu0  ;;  %v207_v34 = vpop.f32.mrf.mxu1 }
  0xd9   :  { %v1676_v0 = vmul.f32 0.70710677, %v296_v60  ;;  %v1678_v1 = vmul.f32 0.70710677, %v312_v61  ;;  %v297_v4 = vadd.f32 %v1670_v58, %v253_v62  ;;  %v1683_v5 = vadd.f32 %v1670_v58, %v269_v63 }
  0xda   :  { %v254_v13 = vmul.f32 %v1656_v44, %v166_v2  ;;  %v270_v22 = vmul.f32 %v1656_v44, %v206_v10  ;;  %v168_v33 = vadd.f32 %v167_v25, %v1658_v45  ;;  %v1704_v35 = vmul.f32 0.5, %v296_v60  ;;  %v171_v43 = vpop.f32.mrf.mxu0 }
  0xdb   :  { %v392_v6 = vand.u32 2147483647, %v1676_v0  ;;  %v408_v7 = vand.u32 2147483647, %v1678_v1  ;;  %v1687_v8 = vmul.f32 0.70710677, %v297_v4  ;;  %v208_v48 = vadd.f32 %v207_v34, %v1658_v45 }
  0xdc   :  { %v1690_v9 = vmul.f32 0.70710677, %v1683_v5  ;;  %v298_v24 = vadd.f32 %v1661_v49, %v254_v13  ;;  %v1701_v32 = vadd.f32 %v1661_v49, %v270_v22  ;;  %v1707_v39 = vmul.f32 0.5, %v312_v61 }
  0xdd   :  { %v424_v11 = vmul.f32 0.3275911, %v392_v6  ;;  %v440_v12 = vmul.f32 0.3275911, %v408_v7  ;;  %v840_v14 = vsub.f32 0.0, %v392_v6  ;;  %v856_v19 = vsub.f32 0.0, %v408_v7 }
  0xde   :  { %v393_v15 = vand.u32 2147483647, %v1687_v8  ;;  %v409_v16 = vand.u32 2147483647, %v1690_v9  ;;  %v1698_v29 = vmul.f32 0.70710677, %v298_v24  ;;  %v255_v41 = vmul.f32 %v1664_v51, %v168_v33 }
  0xdf   :  { %v456_v17 = vadd.f32 1.0, %v424_v11  ;;  %v472_v18 = vadd.f32 1.0, %v440_v12  ;;  %v872_v26 = vmul.f32 %v840_v14, %v392_v6  ;;  %v888_v30 = vmul.f32 %v856_v19, %v408_v7 }
  0xe0   :  { %v425_v20 = vmul.f32 0.3275911, %v393_v15  ;;  %v441_v21 = vmul.f32 0.3275911, %v409_v16  ;;  %v841_v23 = vsub.f32 0.0, %v393_v15  ;;  %v857_v31 = vsub.f32 0.0, %v409_v16 }
  0xe1   :  { %1386 = vrcp.f32 %v456_v17  ;;  %v394_v37 = vand.u32 2147483647, %v1698_v29  ;;  %v904_v38 = vmul.f32 1.442695, %v872_v26  ;;  %v1710_v40 = vmul.f32 0.70710677, %v1701_v32 }
  0xe2   :  { %1388 = vrcp.f32 %v472_v18  ;;  %v457_v27 = vadd.f32 1.0, %v425_v20  ;;  %v473_v28 = vadd.f32 1.0, %v441_v21  ;;  %v873_v36 = vmul.f32 %v841_v23, %v393_v15  ;;  %v211_v21 = vpop.f32.mrf.mxu1 }
  0xe3   :  { %v426_v46 = vmul.f32 0.3275911, %v394_v37  ;;  %v842_v47 = vsub.f32 0.0, %v394_v37  ;;  %v936_v50 = vmul.f32 1.442695, %v888_v30  ;;  %v889_v52 = vmul.f32 %v857_v31, %v409_v16 }
  0xe4   :  { %1390 = vrcp.f32 %v457_v27  ;;  %v410_v53 = vand.u32 2147483647, %v1710_v40  ;;  %v1716_v54 = vadd.f32 %v1670_v58, %v255_v41  ;;  %v906_v55 = vmul.f32 1.442695, %v873_v36 }
  0xe5   :  { %1392 = vrcp.f32 %v473_v28  ;;  %v458_v56 = vadd.f32 1.0, %v426_v46  ;;  %v271_v57 = vmul.f32 %v1664_v51, %v208_v48  ;;  %v172_v59 = vadd.f32 %v171_v43, %v1651_v42 }
  0xe6   :  { %v1720_v60 = vmul.f32 0.5, %v297_v4  ;;  %v442_v61 = vmul.f32 0.3275911, %v410_v53  ;;  %v858_v62 = vsub.f32 0.0, %v410_v53  ;;  %v1723_v63 = vmul.f32 0.70710677, %v1716_v54 }
  0xe7   :  { %1394 = vrcp.f32 %v458_v56  ;;  %v874_v2 = vmul.f32 %v842_v47, %v394_v37  ;;  %v1726_v3 = vadd.f32 %v1670_v58, %v271_v57  ;;  %v256_v6 = vmul.f32 %v1656_v44, %v172_v59 }
  0xe8   :  { %1396 = vpow2.f32 %v904_v38  ;;  %v474_v7 = vadd.f32 1.0, %v442_v61  ;;  %v890_v10 = vmul.f32 %v858_v62, %v410_v53  ;;  %v395_v11 = vand.u32 2147483647, %v1723_v63 }
  0xe9   :  { %1398 = vpow2.f32 %v936_v50  ;;  %v1731_v4 = vmul.f32 0.5, %v1683_v5  ;;  %v938_v12 = vmul.f32 1.442695, %v889_v52  ;;  %v1734_v13 = vmul.f32 0.70710677, %v1726_v3 }
  0xea   :  { %v1738_v15 = vmul.f32 0.5, %v298_v24  ;;  %1400 = vrcp.f32 %v474_v7  ;;  %v427_v16 = vmul.f32 0.3275911, %v395_v11  ;;  %v1741_v17 = vadd.f32 %v1661_v49, %v256_v6 }
  0xeb   :  { %1402 = vpow2.f32 %v906_v55  ;;  %v908_v5 = vmul.f32 1.442695, %v874_v2  ;;  %v411_v20 = vand.u32 2147483647, %v1734_v13  ;;  %v940_v23 = vmul.f32 1.442695, %v890_v10 }
  0xec   :  { %v459_v25 = vadd.f32 1.0, %v427_v16  ;;  %v843_v24 = vsub.f32 0.0, %v395_v11  ;;  %1404 = vpow2.f32 %v938_v12  ;;  %v1751_v33 = vmul.f32 0.70710677, %v1741_v17 }
  0xed   :  { %v443_v27 = vmul.f32 0.3275911, %v411_v20  ;;  %v859_v28 = vsub.f32 0.0, %v411_v20  ;;  %v212_v34 = vadd.f32 %v211_v21, %v1651_v42  ;;  %vm1032_vm3 = vcmp.ge.f32.partialorder %v1676_v0, 0.0 }
  0xee   :  { %v1736_v14 = vpop.eup %1386  ;;  %1406 = vrcp.f32 %v459_v25  ;;  %v875_v46 = vmul.f32 %v843_v24, %v395_v11  ;;  %v396_v47 = vand.u32 2147483647, %v1751_v33  ;;  %vm1048_vm4 = vcmp.ge.f32.partialorder %v1678_v1, 0.0 }
  0xef   :  { %v1743_v18 = vpop.eup %1388  ;;  %v552_v19 = vmul.f32 1.0614054, %v1736_v14  ;;  %1408 = vpow2.f32 %v908_v5  ;;  %v475_v38 = vadd.f32 1.0, %v443_v27  ;;  %v891_v55 = vmul.f32 %v859_v28, %v411_v20 }
  0xf0   :  { %v568_v22 = vmul.f32 1.0614054, %v1743_v18  ;;  %1410 = vpow2.f32 %v940_v23  ;;  %v428_v56 = vmul.f32 0.3275911, %v396_v47  ;;  %v272_v57 = vmul.f32 %v1656_v44, %v212_v34 }
  0xf1   :  { %v584_v26 = vadd.f32 -1.4531521, %v552_v19  ;;  %v1748_v30 = vpop.eup %1390  ;;  %1412 = vrcp.f32 %v475_v38  ;;  %v844_v2 = vsub.f32 0.0, %v396_v47  ;;  %v910_v10 = vmul.f32 1.442695, %v875_v46 }
  0xf2   :  { %v600_v31 = vadd.f32 -1.4531521, %v568_v22  ;;  %v553_v37 = vmul.f32 1.0614054, %v1748_v30  ;;  %v1756_v41 = vpop.eup %1392  ;;  %v460_v11 = vadd.f32 1.0, %v428_v56  ;;  %v1768_v12 = vadd.f32 %v1661_v49, %v272_v57 }
  0xf3   :  { %v616_v36 = vmul.f32 %v1736_v14, %v584_v26  ;;  %v569_v52 = vmul.f32 1.0614054, %v1756_v41  ;;  %v1772_v25 = vmul.f32 1.442695, %v891_v55  ;;  %v876_v24 = vmul.f32 %v844_v2, %v396_v47 }
  0xf4   :  { %v632_v43 = vmul.f32 %v1743_v18, %v600_v31  ;;  %v585_v50 = vadd.f32 -1.4531521, %v553_v37  ;;  %v1764_v6 = vpop.eup %1394  ;;  %1414 = vrcp.f32 %v460_v11  ;;  %v1783_v46 = vmul.f32 0.70710677, %v1768_v12 }
  0xf5   :  { %v648_v48 = vadd.f32 1.4214138, %v616_v36  ;;  %v601_v62 = vadd.f32 -1.4531521, %v569_v52  ;;  %v1397_v16 = vpop.eup %1396  ;;  %v554_v21 = vmul.f32 1.0614054, %v1764_v6  ;;  %1416 = vpow2.f32 %v910_v10 }
  0xf6   :  { %v664_v53 = vadd.f32 1.4214138, %v632_v43  ;;  %v617_v61 = vmul.f32 %v1748_v30, %v585_v50  ;;  %v1399_v22 = vpop.eup %1398  ;;  %v1780_v43 = vmul.f32 1.442695, %v876_v24  ;;  %v1789_v57 = vand.u32 2147483647, %v1783_v46 }
  0xf7   :  { %v680_v59 = vmul.f32 %v1736_v14, %v648_v48  ;;  %v633_v20 = vmul.f32 %v1756_v41, %v601_v62  ;;  %v1774_v26 = vpop.eup %1400  ;;  %v586_v34 = vadd.f32 -1.4531521, %v554_v21  ;;  %vm1033_vm5 = vcmp.ge.f32.partialorder %v1687_v8, 0.0 }
  0xf8   :  { %v696_v7 = vmul.f32 %v1743_v18, %v664_v53  ;;  %v649_v5 = vadd.f32 1.4214138, %v617_v61  ;;  %v1403_v36 = vpop.eup %1402  ;;  %v570_v38 = vmul.f32 1.0614054, %v1774_v26  ;;  %vm1049_vm6 = vcmp.ge.f32.partialorder %v1690_v9, 0.0 }
  0xf9   :  { %v712_v19 = vadd.f32 -0.28449672, %v680_v59  ;;  %v665_v31 = vadd.f32 1.4214138, %v633_v20  ;;  %v618_v52 = vmul.f32 %v1764_v6, %v586_v34  ;;  %v1405_v53 = vpop.eup %1404  ;;  %v444_v20 = vmul.f32 0.3275911, %v1789_v57 }
  0xfa   :  { %v728_v23 = vadd.f32 -0.28449672, %v696_v7  ;;  %v681_v28 = vmul.f32 %v1748_v30, %v649_v5  ;;  %v602_v56 = vadd.f32 -1.4531521, %v570_v38  ;;  %vm1034_vm7 = vcmp.ge.f32.partialorder %v1698_v29, 0.0 }
  0xfb   :  { %v744_v27 = vmul.f32 %v1736_v14, %v712_v19  ;;  %v697_v50 = vmul.f32 %v1756_v41, %v665_v31  ;;  %v1791_v59 = vpop.eup %1406  ;;  %v650_v7 = vadd.f32 1.4214138, %v618_v52  ;;  %vm1050_vm8 = vcmp.ge.f32.partialorder %v1710_v40, 0.0 }
  0xfc   :  { %v760_v37 = vmul.f32 %v1743_v18, %v728_v23  ;;  %v713_v47 = vadd.f32 -0.28449672, %v681_v28  ;;  %v1409_v11 = vpop.eup %1408  ;;  %v634_v5 = vmul.f32 %v1774_v26, %v602_v56  ;;  %v555_v10 = vmul.f32 1.0614054, %v1791_v59 }
  0xfd   :  { %v776_v48 = vadd.f32 0.2548296, %v744_v27  ;;  %v729_v2 = vadd.f32 -0.28449672, %v697_v50  ;;  %v1411_v21 = vpop.eup %1410  ;;  %v682_v27 = vmul.f32 %v1764_v6, %v650_v7  ;;  %vm1035_vm9 = vcmp.ge.f32.partialorder %v1723_v63, 0.0 }
  0xfe   :  { %v792_v55 = vadd.f32 0.2548296, %v760_v37  ;;  %v745_v62 = vmul.f32 %v1748_v30, %v713_v47  ;;  %v1802_v28 = vpop.eup %1412  ;;  %v666_v34 = vadd.f32 1.4214138, %v634_v5  ;;  %v476_v37 = vadd.f32 1.0, %v444_v20 }
  0xff   :  { %v808_v61 = vmul.f32 %v1736_v14, %v776_v48  ;;  %v761_v14 = vmul.f32 %v1756_v41, %v729_v2  ;;  %v714_v50 = vadd.f32 -0.28449672, %v682_v27  ;;  %v571_v56 = vmul.f32 1.0614054, %v1802_v28 }
 0x100   :  { %v824_v19 = vmul.f32 %v1743_v18, %v792_v55  ;;  %v777_v24 = vadd.f32 0.2548296, %v745_v62  ;;  %v587_v18 = vadd.f32 -1.4531521, %v555_v10  ;;  %1418 = vrcp.f32 %v476_v37 }
 0x101   :  { %v968_v23 = vmul.f32 %v1397_v16, %v808_v61  ;;  %v793_v47 = vadd.f32 0.2548296, %v761_v14  ;;  %v698_v16 = vmul.f32 %v1774_v26, %v666_v34  ;;  %v746_v2 = vmul.f32 %v1764_v6, %v714_v50  ;;  %v1812_v5 = vpop.eup %1414 }
 0x102   :  { %v984_v31 = vmul.f32 %v1399_v22, %v824_v19  ;;  %v809_v48 = vmul.f32 %v1748_v30, %v777_v24  ;;  %v619_v55 = vmul.f32 %v1791_v59, %v587_v18  ;;  %1420 = vpow2.f32 %v1772_v25 }
 0x103   :  { %v1000_v38 = vsub.f32 1.0, %v968_v23  ;;  %v825_v62 = vmul.f32 %v1756_v41, %v793_v47  ;;  %v730_v19 = vadd.f32 -0.28449672, %v698_v16  ;;  %v778_v24 = vadd.f32 0.2548296, %v746_v2 }
 0x104   :  { %v1016_v52 = vsub.f32 1.0, %v984_v31  ;;  %v969_v61 = vmul.f32 %v1403_v36, %v809_v48  ;;  %v651_v30 = vadd.f32 1.4214138, %v619_v55  ;;  %v603_v48 = vadd.f32 -1.4531521, %v571_v56 }
 0x105   :  { %v1064_v22 = vsub.f32 0.0, %v1000_v38  ;;  %v985_v23 = vmul.f32 %v1405_v53, %v825_v62  ;;  %v762_v41 = vmul.f32 %v1774_v26, %v730_v19  ;;  %v810_v37 = vmul.f32 %v1764_v6, %v778_v24  ;;  %v1417_v53 = vpop.eup %1416 }
 0x106   :  { %v1080_v7 = vsub.f32 0.0, %v1016_v52  ;;  %v1001_v20 = vsub.f32 1.0, %v969_v61  ;;  %v683_v27 = vmul.f32 %v1791_v59, %v651_v30  ;;  %v635_v6 = vmul.f32 %v1802_v28, %v603_v48 }
 0x107   :  { %v1096_v10 = vsel %vm1032_vm3, %v1000_v38, %v1064_v22  ;;  %v1017_v18 = vsub.f32 1.0, %v985_v23  ;;  %v794_v0 = vadd.f32 0.2548296, %v762_v41  ;;  %v556_v25 = vmul.f32 1.0614054, %v1812_v5 }
 0x108   :  { %v1128_v14 = vadd.f32 1.0, %v1096_v10  ;;  %v1112_v36 = vsel %vm1048_vm4, %v1016_v52, %v1080_v7  ;;  %v1065_v34 = vsub.f32 0.0, %v1001_v20  ;;  %v715_v38 = vadd.f32 -0.28449672, %v683_v27  ;;  %v173_v10 = vpop.f32.mrf.mxu0 }
 0x109   :  { %v1144_v31 = vadd.f32 1.0, %v1112_v36  ;;  %v1081_v50 = vsub.f32 0.0, %v1017_v18  ;;  %v970_v52 = vmul.f32 %v1409_v11, %v810_v37  ;;  %v826_v55 = vmul.f32 %v1774_v26, %v794_v0 }
 0x10a   :  { %v1160_v1 = vmul.f32 %v1128_v14, %v1704_v35  ;;  %v1097_v47 = vsel %vm1033_vm5, %v1001_v20, %v1065_v34  ;;  %v747_v22 = vmul.f32 %v1791_v59, %v715_v38  ;;  %v860_v35 = vsub.f32 0.0, %v1789_v57  ;;  %v175_v34 = vpop.f32.mrf.mxu0 }
 0x10b   :  { %v1129_v16 = vadd.f32 1.0, %v1097_v47  ;;  %v1113_v56 = vsel %vm1049_vm6, %v1017_v18, %v1081_v50  ;;  %v1002_v61 = vsub.f32 1.0, %v970_v52  ;;  %v986_v2 = vmul.f32 %v1411_v21, %v826_v55 }
 0x10c   :  { %v1145_v62 = vadd.f32 1.0, %v1113_v56  ;;  %v779_v11 = vadd.f32 0.2548296, %v747_v22  ;;  %v667_v19 = vadd.f32 1.4214138, %v635_v6  ;;  %v892_v30 = vmul.f32 %v860_v35, %v1789_v57 }
 0x10d   :  { %v1161_v8 = vmul.f32 %v1129_v16, %v1720_v60  ;;  %v1066_v7 = vsub.f32 0.0, %v1002_v61  ;;  %v588_v26 = vadd.f32 -1.4531521, %v556_v25  ;;  %v1176_v20 = vmul.f32 %v1144_v31, %v1707_v39  ;;  %v213_v31 = vpop.f32.mrf.mxu1 }
 0x10e   :  { %v1177_v23 = vmul.f32 %v1145_v62, %v1731_v4  ;;  %v811_v24 = vmul.f32 %v1791_v59, %v779_v11  ;;  %v1018_v60 = vsub.f32 1.0, %v986_v2  ;;  %v699_v21 = vmul.f32 %v1802_v28, %v667_v19  ;;  %v1845_v4 = vpop.eup %1418 }
 0x10f   :  { %v1350_v9 = vpack.c.bf16 %v1161_v8, %v1160_v1  ;;  %v1098_v14 = vsel %vm1034_vm7, %v1002_v61, %v1066_v7  ;;  %v620_v36 = vmul.f32 %v1812_v5, %v588_v26  ;;  %v331_v41 = vmul.f32 0.5, %v1716_v54  ;;  %v1421_v16 = vpop.eup %1420 }
 0x110   :  { %v1358_v57 = vpack.c.bf16 %v1177_v23, %v1176_v20  ;;  %v971_v39 = vmul.f32 %v1417_v53, %v811_v24  ;;  %v731_v59 = vadd.f32 -0.28449672, %v699_v21  ;;  %v944_v29 = vmul.f32 1.442695, %v892_v30  ;;  %v215_v24 = vpop.f32.mrf.mxu1 }
 0x111   :  { %1288 = vst [vmem:[#allocation2] sm:$0xff] %v1350_v9  ;;  %v652_v27 = vadd.f32 1.4214138, %v620_v36  ;;  %v1130_v18 = vadd.f32 1.0, %v1098_v14  ;;  %1422 = vpow2.f32 %v1780_v43  ;;  %v572_v0 = vmul.f32 1.0614054, %v1845_v4 }
 0x112   :  { %1296 = vst [vmem:[#allocation2 + $0x40] sm:$0xff] %v1358_v57  ;;  %v1003_v37 = vsub.f32 1.0, %v971_v39  ;;  %v1082_v38 = vsub.f32 0.0, %v1018_v60  ;;  %v763_v54 = vmul.f32 %v1802_v28, %v731_v59  ;;  %v174_v53 = vadd.f32 %v173_v10, %v1658_v45 }
 0x113   :  { %v684_v48 = vmul.f32 %v1812_v5, %v652_v27  ;;  %v604_v47 = vadd.f32 -1.4531521, %v572_v0  ;;  %v214_v50 = vadd.f32 %v213_v31, %v1658_v45  ;;  %v176_v52 = vadd.f32 %v175_v34, %v1651_v42 }
 0x114   :  { %v1067_v1 = vsub.f32 0.0, %v1003_v37  ;;  %v795_v55 = vadd.f32 0.2548296, %v763_v54  ;;  %1424 = vpow2.f32 %v944_v29  ;;  %v257_v43 = vmul.f32 %v1664_v51, %v174_v53 }
 0x115   :  { %v716_v22 = vadd.f32 -0.28449672, %v684_v48  ;;  %v636_v56 = vmul.f32 %v1845_v4, %v604_v47  ;;  %v273_v61 = vmul.f32 %v1664_v51, %v214_v50  ;;  %v258_v25 = vmul.f32 %v1656_v44, %v176_v52  ;;  %v177_v48 = vpop.f32.mrf.mxu0 }
 0x116   :  { %v1099_v6 = vsel %vm1035_vm9, %v1003_v37, %v1067_v1  ;;  %v827_v8 = vmul.f32 %v1802_v28, %v795_v55  ;;  %v1863_v2 = vadd.f32 %v1670_v58, %v257_v43  ;;  %v1162_v11 = vmul.f32 %v1130_v18, %v1738_v15  ;;  %v217_v43 = vpop.f32.mrf.mxu1 }
 0x117   :  { %v1131_v35 = vadd.f32 1.0, %v1099_v6  ;;  %v748_v62 = vmul.f32 %v1812_v5, %v716_v22  ;;  %v1114_v63 = vsel %vm1050_vm8, %v1018_v60, %v1082_v38  ;;  %v668_v7 = vadd.f32 1.4214138, %v636_v56  ;;  %v181_v6 = vpop.f32.mrf.mxu0 }
 0x118   :  { %v1869_v19 = vadd.f32 %v1670_v58, %v273_v61  ;;  %v987_v30 = vmul.f32 %v1421_v16, %v827_v8  ;;  %v1872_v20 = vadd.f32 %v1661_v49, %v258_v25  ;;  %v1876_v9 = vmul.f32 0.70710677, %v1863_v2 }
 0x119   :  { %v1163_v26 = vmul.f32 %v1131_v35, %v331_v41  ;;  %v780_v10 = vadd.f32 0.2548296, %v748_v62  ;;  %v700_v28 = vmul.f32 %v1845_v4, %v668_v7  ;;  %v1146_v14 = vadd.f32 1.0, %v1114_v63 }
 0x11a   :  { %v1879_v15 = vmul.f32 0.70710677, %v1869_v19  ;;  %v1019_v23 = vsub.f32 1.0, %v987_v30  ;;  %v397_v21 = vand.u32 2147483647, %v1876_v9  ;;  %vm1051_vm10 = vcmp.ge.f32.partialorder %v1734_v13, 0.0 }
 0x11b   :  { %v1351_v40 = vpack.c.bf16 %v1163_v26, %v1162_v11  ;;  %v732_v60 = vadd.f32 -0.28449672, %v700_v28  ;;  %v812_v57 = vmul.f32 %v1812_v5, %v780_v10  ;;  %v1885_v39 = vmul.f32 0.70710677, %v1872_v20 }
 0x11c   :  { %v1083_v36 = vsub.f32 0.0, %v1019_v23  ;;  %v413_v41 = vand.u32 2147483647, %v1879_v15  ;;  %v429_v27 = vmul.f32 0.3275911, %v397_v21  ;;  %v216_v29 = vadd.f32 %v215_v24, %v1651_v42 }
 0x11d   :  { %1289 = vst [vmem:[#allocation2 + $0x8] sm:$0xff] %v1351_v40  ;;  %v764_v59 = vmul.f32 %v1845_v4, %v732_v60  ;;  %v346_v34 = vmul.f32 0.5, %v1701_v32  ;;  %v347_v0 = vmul.f32 0.5, %v1726_v3  ;;  %v1893_v13 = vand.u32 2147483647, %v1885_v39 }
 0x11e   :  { %v1423_v31 = vpop.eup %1422  ;;  %v1115_v18 = vsel %vm1051_vm10, %v1019_v23, %v1083_v36  ;;  %v445_v37 = vmul.f32 0.3275911, %v413_v41  ;;  %v461_v54 = vadd.f32 1.0, %v429_v27  ;;  %v845_v16 = vsub.f32 0.0, %v397_v21 }
 0x11f   :  { %v1147_v5 = vadd.f32 1.0, %v1115_v18  ;;  %v796_v38 = vadd.f32 0.2548296, %v764_v59  ;;  %v1178_v53 = vmul.f32 %v1146_v14, %v346_v34  ;;  %v972_v1 = vmul.f32 %v1423_v31, %v812_v57 }
 0x120   :  { %v477_v47 = vadd.f32 1.0, %v445_v37  ;;  %1426 = vrcp.f32 %v461_v54  ;;  %v274_v32 = vmul.f32 %v1656_v44, %v216_v29  ;;  %v430_v3 = vmul.f32 0.3275911, %v1893_v13  ;;  %v221_v29 = vpop.f32.mrf.mxu1 }
 0x121   :  { %v1425_v50 = vpop.eup %1424  ;;  %v1179_v52 = vmul.f32 %v1147_v5, %v347_v0  ;;  %v828_v55 = vmul.f32 %v1845_v4, %v796_v38  ;;  %v1004_v56 = vsub.f32 1.0, %v972_v1  ;;  %v861_v61 = vsub.f32 0.0, %v413_v41 }
 0x122   :  { %1428 = vrcp.f32 %v477_v47  ;;  %v462_v25 = vadd.f32 1.0, %v430_v3  ;;  %v877_v35 = vmul.f32 %v845_v16, %v397_v21  ;;  %v1899_v8 = vadd.f32 %v1661_v49, %v274_v32 }
 0x123   :  { %v1359_v22 = vpack.c.bf16 %v1179_v52, %v1178_v53  ;;  %v178_v62 = vadd.f32 %v177_v48, %v1658_v45  ;;  %v988_v11 = vmul.f32 %v1425_v50, %v828_v55  ;;  %v218_v4 = vadd.f32 %v217_v43, %v1658_v45 }
 0x124   :  { %1430 = vrcp.f32 %v462_v25  ;;  %v182_v63 = vadd.f32 %v181_v6, %v1651_v42  ;;  %v332_v7 = vmul.f32 0.5, %v1741_v17  ;;  %vm1036_vm11 = vcmp.ge.f32.partialorder %v1751_v33, 0.0 }
 0x125   :  { %1297 = vst [vmem:[#allocation2 + $0x48] sm:$0xff] %v1359_v22  ;;  %v1907_v26 = vmul.f32 0.70710677, %v1899_v8  ;;  %v259_v30 = vmul.f32 %v1664_v51, %v178_v62  ;;  %v1068_v10 = vsub.f32 0.0, %v1004_v56  ;;  %v893_v28 = vmul.f32 %v861_v61, %v413_v41 }
 0x126   :  { %v275_v40 = vmul.f32 %v1664_v51, %v218_v4  ;;  %v260_v23 = vmul.f32 %v1656_v44, %v182_v63  ;;  %v1913_v24 = vmul.f32 0.5, %v1768_v12  ;;  %v914_v14 = vmul.f32 1.442695, %v877_v35 }
 0x127   :  { %v414_v60 = vand.u32 2147483647, %v1907_v26  ;;  %v1917_v17 = vadd.f32 %v1670_v58, %v259_v30  ;;  %v1020_v21 = vsub.f32 1.0, %v988_v11  ;;  %vm1052_vm12 = vcmp.ge.f32.partialorder %v1783_v46, 0.0 }
 0x128   :  { %v1921_v36 = vadd.f32 %v1670_v58, %v275_v40  ;;  %v1924_v57 = vadd.f32 %v1661_v49, %v260_v23  ;;  %v1927_v41 = vmul.f32 0.5, %v1863_v2  ;;  %v1930_v12 = vmul.f32 0.5, %v1869_v19  ;;  %v183_v40 = vpop.f32.mrf.mxu0 }
 0x129   :  { %v446_v59 = vmul.f32 0.3275911, %v414_v60  ;;  %v1933_v27 = vmul.f32 0.70710677, %v1917_v17  ;;  %v1100_v31 = vsel %vm1036_vm11, %v1004_v56, %v1068_v10  ;;  %v946_v34 = vmul.f32 1.442695, %v893_v28 }
 0x12a   :  { %v846_v18 = vsub.f32 0.0, %v1893_v13  ;;  %v1939_v37 = vmul.f32 0.70710677, %v1921_v36  ;;  %1432 = vpow2.f32 %v914_v14  ;;  %v1942_v2 = vmul.f32 0.5, %v1872_v20 }
 0x12b   :  { %v478_v19 = vadd.f32 1.0, %v446_v59  ;;  %v399_v0 = vand.u32 2147483647, %v1933_v27  ;;  %v1084_v38 = vsub.f32 0.0, %v1020_v21  ;;  %v1949_v33 = vmul.f32 0.70710677, %v1924_v57 }
 0x12c   :  { %v415_v54 = vand.u32 2147483647, %v1939_v37  ;;  %v222_v48 = vadd.f32 %v221_v29, %v1651_v42  ;;  %v1132_v1 = vadd.f32 1.0, %v1100_v31  ;;  %v878_v52 = vmul.f32 %v846_v18, %v1893_v13 }
 0x12d   :  { %v1945_v5 = vpop.eup %1426  ;;  %1434 = vrcp.f32 %v478_v19  ;;  %v431_v20 = vmul.f32 0.3275911, %v399_v0  ;;  %v862_v55 = vsub.f32 0.0, %v414_v60  ;;  %v400_v22 = vand.u32 2147483647, %v1949_v33 }
 0x12e   :  { %v557_v47 = vmul.f32 1.0614054, %v1945_v5  ;;  %1436 = vpow2.f32 %v946_v34  ;;  %v447_v16 = vmul.f32 0.3275911, %v415_v54  ;;  %v1116_v43 = vsel %vm1052_vm12, %v1020_v21, %v1084_v38 }
 0x12f   :  { %v1952_v53 = vpop.eup %1428  ;;  %v463_v3 = vadd.f32 1.0, %v431_v20  ;;  %v276_v61 = vmul.f32 %v1656_v44, %v222_v48  ;;  %v847_v62 = vsub.f32 0.0, %v399_v0  ;;  %v432_v13 = vmul.f32 0.3275911, %v400_v22 }
 0x130   :  { %v573_v50 = vmul.f32 1.0614054, %v1952_v53  ;;  %v589_v32 = vadd.f32 -1.4531521, %v557_v47  ;;  %v479_v56 = vadd.f32 1.0, %v447_v16  ;;  %v1964_v11 = vmul.f32 %v1132_v1, %v332_v7 }
 0x131   :  { %v1961_v25 = vpop.eup %1430  ;;  %1438 = vrcp.f32 %v463_v3  ;;  %v916_v30 = vmul.f32 1.442695, %v878_v52  ;;  %v894_v10 = vmul.f32 %v862_v55, %v414_v60  ;;  %v464_v28 = vadd.f32 1.0, %v432_v13 }
 0x132   :  { %v605_v6 = vadd.f32 -1.4531521, %v573_v50  ;;  %v621_v35 = vmul.f32 %v1945_v5, %v589_v32  ;;  %v558_v63 = vmul.f32 1.0614054, %v1961_v25  ;;  %1440 = vrcp.f32 %v479_v56 }
 0x133   :  { %v1148_v23 = vadd.f32 1.0, %v1116_v43  ;;  %v863_v59 = vsub.f32 0.0, %v415_v54  ;;  %v879_v31 = vmul.f32 %v847_v62, %v399_v0  ;;  %v848_v34 = vsub.f32 0.0, %v400_v22 }
 0x134   :  { %v637_v4 = vmul.f32 %v1952_v53, %v605_v6  ;;  %v653_v46 = vadd.f32 1.4214138, %v621_v35  ;;  %v590_v21 = vadd.f32 -1.4531521, %v558_v63  ;;  %v1970_v7 = vadd.f32 %v1661_v49, %v276_v61 }
 0x135   :  { %1442 = vrcp.f32 %v464_v28  ;;  %v184_v60 = vadd.f32 %v183_v40, %v1658_v45  ;;  %v948_v48 = vmul.f32 1.442695, %v894_v10  ;;  %v895_v50 = vmul.f32 %v863_v59, %v415_v54 }
 0x136   :  { %v669_v14 = vadd.f32 1.4214138, %v637_v4  ;;  %v685_v29 = vmul.f32 %v1945_v5, %v653_v46  ;;  %v622_v19 = vmul.f32 %v1961_v25, %v590_v21  ;;  %1444 = vpow2.f32 %v916_v30 }
 0x137   :  { %v1976_v1 = vmul.f32 0.70710677, %v1970_v7  ;;  %v1433_v47 = vpop.eup %1432  ;;  %v261_v52 = vmul.f32 %v1664_v51, %v184_v60  ;;  %v1981_v32 = vmul.f32 0.5, %v1899_v8  ;;  %v918_v55 = vmul.f32 1.442695, %v879_v31 }
 0x138   :  { %v701_v18 = vmul.f32 %v1952_v53, %v669_v14  ;;  %v717_v38 = vadd.f32 -0.28449672, %v685_v29  ;;  %v654_v0 = vadd.f32 1.4214138, %v622_v19  ;;  %v880_v61 = vmul.f32 %v848_v34, %v400_v22 }
 0x139   :  { %v1984_v3 = vand.u32 2147483647, %v1976_v1  ;;  %v1991_v54 = vadd.f32 %v1670_v58, %v261_v52  ;;  %v1994_v62 = vmul.f32 %v1148_v23, %v1913_v24  ;;  %vm1037_vm13 = vcmp.ge.f32.partialorder %v1876_v9, 0.0  ;;  %v223_v24 = vpop.f32.mrf.mxu1 }
 0x13a   :  { %v733_v20 = vadd.f32 -0.28449672, %v701_v18  ;;  %v749_v16 = vmul.f32 %v1945_v5, %v717_v38  ;;  %v1986_v43 = vpop.eup %1434  ;;  %v686_v56 = vmul.f32 %v1961_v25, %v654_v0  ;;  %1446 = vpow2.f32 %v948_v48  ;;  %v185_v18 = vpop.f32.mrf.mxu0 }
 0x13b   :  { %v1437_v35 = vpop.eup %1436  ;;  %v574_v13 = vmul.f32 1.0614054, %v1986_v43  ;;  %v448_v4 = vmul.f32 0.3275911, %v1984_v3  ;;  %v950_v30 = vmul.f32 1.442695, %v895_v50  ;;  %1448 = vpow2.f32 %v918_v55 }
 0x13c   :  { %v765_v6 = vmul.f32 %v1952_v53, %v733_v20  ;;  %v781_v8 = vadd.f32 0.2548296, %v749_v16  ;;  %v718_v46 = vadd.f32 -0.28449672, %v686_v56  ;;  %vm1053_vm14 = vcmp.ge.f32.partialorder %v1879_v15, 0.0 }
 0x13d   :  { %v606_v10 = vadd.f32 -1.4531521, %v574_v13  ;;  %v480_v28 = vadd.f32 1.0, %v448_v4  ;;  %v2005_v21 = vmul.f32 1.442695, %v880_v61  ;;  %v224_v38 = vadd.f32 %v223_v24, %v1658_v45 }
 0x13e   :  { %v797_v63 = vadd.f32 0.2548296, %v765_v6  ;;  %v813_v22 = vmul.f32 %v1945_v5, %v781_v8  ;;  %v2001_v40 = vpop.eup %1438  ;;  %v750_v14 = vmul.f32 %v1961_v25, %v718_v46  ;;  %v2008_v59 = vmul.f32 0.70710677, %v1991_v54 }
 0x13f   :  { %v2010_v29 = vpop.eup %1440  ;;  %v638_v31 = vmul.f32 %v1986_v43, %v606_v10  ;;  %v559_v34 = vmul.f32 1.0614054, %v2001_v40  ;;  %1450 = vrcp.f32 %v480_v28  ;;  %v186_v16 = vadd.f32 %v185_v18, %v1651_v42 }
 0x140   :  { %v829_v23 = vmul.f32 %v1952_v53, %v797_v63  ;;  %v973_v5 = vmul.f32 %v1433_v47, %v813_v22  ;;  %v782_v60 = vadd.f32 0.2548296, %v750_v14  ;;  %v575_v53 = vmul.f32 1.0614054, %v2010_v29 }
 0x141   :  { %v670_v20 = vadd.f32 1.4214138, %v638_v31  ;;  %v591_v0 = vadd.f32 -1.4531521, %v559_v34  ;;  %1452 = vpow2.f32 %v950_v30  ;;  %vm1038_vm15 = vcmp.ge.f32.partialorder %v1885_v39, 0.0 }
 0x142   :  { %v989_v19 = vmul.f32 %v1437_v35, %v829_v23  ;;  %v1005_v48 = vsub.f32 1.0, %v973_v5  ;;  %v814_v52 = vmul.f32 %v1961_v25, %v782_v60  ;;  %v607_v47 = vadd.f32 -1.4531521, %v575_v53  ;;  %v2018_v55 = vpop.eup %1442 }
 0x143   :  { %v702_v56 = vmul.f32 %v1986_v43, %v670_v20  ;;  %v623_v61 = vmul.f32 %v2001_v40, %v591_v0  ;;  %v2023_v35 = vand.u32 2147483647, %v2008_v59  ;;  %v1445_v8 = vpop.eup %1444  ;;  %v560_v63 = vmul.f32 1.0614054, %v2018_v55 }
 0x144   :  { %v1021_v50 = vsub.f32 1.0, %v989_v19  ;;  %v1069_v6 = vsub.f32 0.0, %v1005_v48  ;;  %v639_v4 = vmul.f32 %v2010_v29, %v607_v47  ;;  %v277_v25 = vmul.f32 %v1664_v51, %v224_v38 }
 0x145   :  { %v734_v30 = vadd.f32 -0.28449672, %v702_v56  ;;  %v655_v22 = vadd.f32 1.4214138, %v623_v61  ;;  %v433_v10 = vmul.f32 0.3275911, %v2023_v35  ;;  %v974_v23 = vmul.f32 %v1445_v8, %v814_v52 }
 0x146   :  { %v1085_v13 = vsub.f32 0.0, %v1021_v50  ;;  %v1101_v46 = vsel %vm1037_vm13, %v1005_v48, %v1069_v6  ;;  %v671_v14 = vadd.f32 1.4214138, %v639_v4  ;;  %v592_v18 = vadd.f32 -1.4531521, %v560_v63 }
 0x147   :  { %v1133_v28 = vadd.f32 1.0, %v1101_v46  ;;  %v766_v31 = vmul.f32 %v1986_v43, %v734_v30  ;;  %v687_v34 = vmul.f32 %v2001_v40, %v655_v22  ;;  %v864_v60 = vsub.f32 0.0, %v1984_v3  ;;  %v1447_v38 = vpop.eup %1446 }
 0x148   :  { %v1117_v24 = vsel %vm1053_vm14, %v1021_v50, %v1085_v13  ;;  %v703_v9 = vmul.f32 %v2010_v29, %v671_v14  ;;  %v465_v53 = vadd.f32 1.0, %v433_v10  ;;  %v624_v0 = vmul.f32 %v2018_v55, %v592_v18  ;;  %v1449_v50 = vpop.eup %1448 }
 0x149   :  { %v1149_v5 = vadd.f32 1.0, %v1117_v24  ;;  %v1165_v19 = vmul.f32 %v1133_v28, %v1927_v41  ;;  %v798_v15 = vadd.f32 0.2548296, %v766_v31  ;;  %v719_v20 = vadd.f32 -0.28449672, %v687_v34 }
 0x14a   :  { %v735_v47 = vadd.f32 -0.28449672, %v703_v9  ;;  %1454 = vrcp.f32 %v465_v53  ;;  %v2043_v41 = vadd.f32 %v1670_v58, %v277_v25  ;;  %v1006_v56 = vsub.f32 1.0, %v974_v23 }
 0x14b   :  { %v1181_v48 = vmul.f32 %v1149_v5, %v1930_v12  ;;  %v1352_v52 = vpack.c.bf16 %v1165_v19, %v1964_v11  ;;  %v830_v61 = vmul.f32 %v1986_v43, %v798_v15  ;;  %vm1054_vm0 = vcmp.ge.f32.partialorder %v1907_v26, 0.0 }
 0x14c   :  { %v751_v12 = vmul.f32 %v2001_v40, %v719_v20  ;;  %v2049_v8 = vpop.eup %1450  ;;  %v335_v11 = vmul.f32 0.5, %v1917_v17  ;;  %v767_v13 = vmul.f32 %v2010_v29, %v735_v47  ;;  %v656_v4 = vadd.f32 1.4214138, %v624_v0 }
 0x14d   :  { %v1360_v6 = vpack.c.bf16 %v1181_v48, %v1994_v62  ;;  %1290 = vst [vmem:[#allocation2 + $0x10] sm:$0xff] %v1352_v52  ;;  %1456 = vpow2.f32 %v2005_v21  ;;  %v990_v63 = vmul.f32 %v1447_v38, %v830_v61  ;;  %v576_v25 = vmul.f32 1.0614054, %v2049_v8 }
 0x14e   :  { %v783_v62 = vadd.f32 0.2548296, %v751_v12  ;;  %v896_v43 = vmul.f32 %v864_v60, %v1984_v3  ;;  %v1453_v46 = vpop.eup %1452  ;;  %v799_v30 = vadd.f32 0.2548296, %v767_v13  ;;  %v688_v22 = vmul.f32 %v2018_v55, %v656_v4 }
 0x14f   :  { %1298 = vst [vmem:[#allocation2 + $0x50] sm:$0xff] %v1360_v6  ;;  %v2058_v10 = vmul.f32 0.70710677, %v2043_v41  ;;  %v262_v17 = vmul.f32 %v1656_v44, %v186_v16  ;;  %v1070_v28 = vsub.f32 0.0, %v1006_v56  ;;  %v1022_v24 = vsub.f32 1.0, %v990_v63 }
 0x150   :  { %v815_v21 = vmul.f32 %v2001_v40, %v783_v62  ;;  %v608_v23 = vadd.f32 -1.4531521, %v576_v25  ;;  %v831_v14 = vmul.f32 %v2010_v29, %v799_v30  ;;  %v720_v5 = vadd.f32 -0.28449672, %v688_v22 }
 0x151   :  { %v849_v31 = vsub.f32 0.0, %v2023_v35  ;;  %v2065_v3 = vand.u32 2147483647, %v2058_v10  ;;  %v1086_v34 = vsub.f32 0.0, %v1022_v24  ;;  %v952_v9 = vmul.f32 1.442695, %v896_v43 }
 0x152   :  { %v975_v18 = vmul.f32 %v1449_v50, %v815_v21  ;;  %v640_v19 = vmul.f32 %v2049_v8, %v608_v23  ;;  %vm1039_vm1 = vcmp.ge.f32.partialorder %v1933_v27, 0.0  ;;  %v991_v16 = vmul.f32 %v1453_v46, %v831_v14  ;;  %v225_v27 = vpop.f32.mrf.mxu1 }
 0x153   :  { %v752_v60 = vmul.f32 %v2018_v55, %v720_v5  ;;  %v449_v40 = vmul.f32 0.3275911, %v2065_v3  ;;  %v1102_v29 = vsel %vm1038_vm15, %v1006_v56, %v1070_v28  ;;  %v2074_v48 = vadd.f32 %v1661_v49, %v262_v17 }
 0x154   :  { %v1007_v53 = vsub.f32 1.0, %v975_v18  ;;  %v672_v38 = vadd.f32 1.4214138, %v640_v19  ;;  %v1118_v15 = vsel %vm1054_vm0, %v1022_v24, %v1086_v34  ;;  %v1023_v20 = vsub.f32 1.0, %v991_v16 }
 0x155   :  { %v881_v0 = vmul.f32 %v849_v31, %v2023_v35  ;;  %v481_v50 = vadd.f32 1.0, %v449_v40  ;;  %v784_v47 = vadd.f32 0.2548296, %v752_v60  ;;  %1458 = vpow2.f32 %v952_v9  ;;  %v187_v31 = vpop.f32.mrf.mxu0  ;;  %v227_v9 = vpop.f32.mrf.mxu1 }
 0x156   :  { %v1071_v52 = vsub.f32 0.0, %v1007_v53  ;;  %v704_v6 = vmul.f32 %v2049_v8, %v672_v38  ;;  %v1134_v61 = vadd.f32 1.0, %v1102_v29  ;;  %vm1055_vm2 = vcmp.ge.f32.partialorder %v1939_v37, 0.0 }
 0x157   :  { %v1087_v39 = vsub.f32 0.0, %v1023_v20  ;;  %1460 = vrcp.f32 %v481_v50  ;;  %v2081_v56 = vpop.eup %1454  ;;  %v1150_v12 = vadd.f32 1.0, %v1118_v15  ;;  %v2086_v35 = vmul.f32 0.70710677, %v2074_v48 }
 0x158   :  { %v1103_v26 = vsel %vm1039_vm1, %v1007_v53, %v1071_v52  ;;  %v736_v13 = vadd.f32 -0.28449672, %v704_v6  ;;  %v561_v62 = vmul.f32 1.0614054, %v2081_v56  ;;  %v922_v25 = vmul.f32 1.442695, %v881_v0  ;;  %v191_v0 = vpop.f32.mrf.mxu0 }
 0x159   :  { %v1135_v4 = vadd.f32 1.0, %v1103_v26  ;;  %v1119_v63 = vsel %vm1055_vm2, %v1023_v20, %v1087_v39  ;;  %v351_v37 = vmul.f32 0.5, %v1921_v36  ;;  %v816_v30 = vmul.f32 %v2018_v55, %v784_v47 }
 0x15a   :  { %v1457_v43 = vpop.eup %1456  ;;  %v1151_v46 = vadd.f32 1.0, %v1119_v63  ;;  %v2092_v22 = vand.u32 2147483647, %v2086_v35  ;;  %v1166_v17 = vmul.f32 %v1134_v61, %v1942_v2  ;;  %v768_v24 = vmul.f32 %v2049_v8, %v736_v13 }
 0x15b   :  { %v1167_v28 = vmul.f32 %v1135_v4, %v335_v11  ;;  %v593_v21 = vadd.f32 -1.4531521, %v561_v62  ;;  %v1182_v23 = vmul.f32 %v1150_v12, %v1981_v32  ;;  %v865_v5 = vsub.f32 0.0, %v2065_v3 }
 0x15c   :  { %v1183_v14 = vmul.f32 %v1151_v46, %v351_v37  ;;  %v434_v36 = vmul.f32 0.3275911, %v2092_v22  ;;  %1462 = vpow2.f32 %v922_v25  ;;  %v226_v18 = vadd.f32 %v225_v27, %v1651_v42 }
 0x15d   :  { %v1353_v34 = vpack.c.bf16 %v1167_v28, %v1166_v17  ;;  %v625_v55 = vmul.f32 %v2081_v56, %v593_v21  ;;  %v976_v2 = vmul.f32 %v1457_v43, %v816_v30  ;;  %v800_v16 = vadd.f32 0.2548296, %v768_v24 }
 0x15e   :  { %v1361_v19 = vpack.c.bf16 %v1183_v14, %v1182_v23  ;;  %v466_v11 = vadd.f32 1.0, %v434_v36  ;;  %v278_v32 = vmul.f32 %v1656_v44, %v226_v18  ;;  %v188_v40 = vadd.f32 %v187_v31, %v1658_v45  ;;  %v231_v18 = vpop.f32.mrf.mxu1 }
 0x15f   :  { %1291 = vst [vmem:[#allocation2 + $0x18] sm:$0xff] %v1353_v34  ;;  %v657_v60 = vadd.f32 1.4214138, %v625_v55  ;;  %v897_v29 = vmul.f32 %v865_v5, %v2065_v3  ;;  %v228_v20 = vadd.f32 %v227_v9, %v1658_v45  ;;  %v2111_v50 = vmul.f32 0.5, %v1924_v57 }
 0x160   :  { %1299 = vst [vmem:[#allocation2 + $0x58] sm:$0xff] %v1361_v19  ;;  %1464 = vrcp.f32 %v466_v11  ;;  %v2106_v38 = vadd.f32 %v1661_v49, %v278_v32  ;;  %v263_v15 = vmul.f32 %v1664_v51, %v188_v40  ;;  %v1008_v52 = vsub.f32 1.0, %v976_v2 }
 0x161   :  { %v689_v53 = vmul.f32 %v2081_v56, %v657_v60  ;;  %v832_v6 = vmul.f32 %v2049_v8, %v800_v16  ;;  %vm1040_vm3 = vcmp.ge.f32.partialorder %v1949_v33, 0.0  ;;  %v954_v26 = vmul.f32 1.442695, %v897_v29 }
 0x162   :  { %v1459_v47 = vpop.eup %1458  ;;  %v2115_v3 = vmul.f32 0.70710677, %v2106_v38  ;;  %v2118_v39 = vadd.f32 %v1670_v58, %v263_v15  ;;  %v279_v13 = vmul.f32 %v1664_v51, %v228_v20  ;;  %v192_v57 = vadd.f32 %v191_v0, %v1651_v42 }
 0x163   :  { %v721_v61 = vadd.f32 -0.28449672, %v689_v53  ;;  %v850_v63 = vsub.f32 0.0, %v2092_v22  ;;  %v1072_v25 = vsub.f32 0.0, %v1008_v52  ;;  %v2130_v43 = vmul.f32 0.5, %v1970_v7 }
 0x164   :  { %v2120_v12 = vpop.eup %1460  ;;  %v418_v62 = vand.u32 2147483647, %v2115_v3  ;;  %v2133_v37 = vmul.f32 0.70710677, %v2118_v39  ;;  %v2136_v46 = vadd.f32 %v1670_v58, %v279_v13  ;;  %v2138_v30 = vmul.f32 %v1459_v47, %v832_v6 }
 0x165   :  { %v753_v4 = vmul.f32 %v2081_v56, %v721_v61  ;;  %v577_v8 = vmul.f32 1.0614054, %v2120_v12  ;;  %v337_v27 = vmul.f32 0.5, %v1991_v54  ;;  %vm1041_vm4 = vcmp.ge.f32.partialorder %v2008_v59, 0.0 }
 0x166   :  { %v450_v24 = vmul.f32 0.3275911, %v418_v62  ;;  %v2143_v21 = vand.u32 2147483647, %v2133_v37  ;;  %v264_v7 = vmul.f32 %v1656_v44, %v192_v57  ;;  %1466 = vpow2.f32 %v954_v26 }
 0x167   :  { %v785_v17 = vadd.f32 0.2548296, %v753_v4  ;;  %v609_v28 = vadd.f32 -1.4531521, %v577_v8  ;;  %v882_v5 = vmul.f32 %v850_v63, %v2092_v22  ;;  %v1104_v54 = vsel %vm1040_vm3, %v1008_v52, %v1072_v25 }
 0x168   :  { %v482_v31 = vadd.f32 1.0, %v450_v24  ;;  %v435_v34 = vmul.f32 0.3275911, %v2143_v21  ;;  %v2153_v55 = vmul.f32 0.70710677, %v2136_v46  ;;  %v1024_v19 = vsub.f32 1.0, %v2138_v30 }
 0x169   :  { %v817_v23 = vmul.f32 %v2081_v56, %v785_v17  ;;  %v641_v14 = vmul.f32 %v2120_v12, %v609_v28  ;;  %v1463_v36 = vpop.eup %1462  ;;  %v866_v11 = vsub.f32 0.0, %v418_v62  ;;  %vm1056_vm5 = vcmp.ge.f32.partialorder %v1976_v1, 0.0 }
 0x16a   :  { %1468 = vrcp.f32 %v482_v31  ;;  %v467_v22 = vadd.f32 1.0, %v435_v34  ;;  %v2158_v9 = vand.u32 2147483647, %v2153_v55  ;;  %v2161_v33 = vadd.f32 %v1661_v49, %v264_v7  ;;  %v233_v34 = vpop.f32.mrf.mxu1 }
 0x16b   :  { %v977_v2 = vmul.f32 %v1463_v36, %v817_v23  ;;  %v673_v56 = vadd.f32 1.4214138, %v641_v14  ;;  %v2166_v32 = vmul.f32 0.5, %v2043_v41  ;;  %v232_v29 = vadd.f32 %v231_v18, %v1651_v42 }
 0x16c   :  { %v1136_v53 = vadd.f32 1.0, %v1104_v54  ;;  %1470 = vrcp.f32 %v467_v22  ;;  %v451_v20 = vmul.f32 0.3275911, %v2158_v9  ;;  %v1088_v0 = vsub.f32 0.0, %v1024_v19 }
 0x16d   :  { %v2163_v16 = vpop.eup %1464  ;;  %v1009_v60 = vsub.f32 1.0, %v977_v2  ;;  %v705_v40 = vmul.f32 %v2120_v12, %v673_v56  ;;  %v924_v6 = vmul.f32 1.442695, %v882_v5  ;;  %v898_v26 = vmul.f32 %v866_v11, %v418_v62  ;;  %v193_v5 = vpop.f32.mrf.mxu0 }
 0x16e   :  { %v562_v15 = vmul.f32 1.0614054, %v2163_v16  ;;  %v483_v13 = vadd.f32 1.0, %v451_v20  ;;  %v2173_v41 = vmul.f32 0.70710677, %v2161_v33  ;;  %v851_v8 = vsub.f32 0.0, %v2143_v21 }
 0x16f   :  { %v1073_v52 = vsub.f32 0.0, %v1009_v60  ;;  %v737_v47 = vadd.f32 -0.28449672, %v705_v40  ;;  %v280_v63 = vmul.f32 %v1656_v44, %v232_v29  ;;  %v2185_v28 = vmul.f32 0.5, %v2074_v48 }
 0x170   :  { %v594_v61 = vadd.f32 -1.4531521, %v562_v15  ;;  %1472 = vrcp.f32 %v483_v13  ;;  %v2182_v17 = vand.u32 2147483647, %v2173_v41  ;;  %v1168_v24 = vmul.f32 %v1136_v53, %v2111_v50 }
 0x171   :  { %v1105_v57 = vsel %vm1041_vm4, %v1009_v60, %v1073_v52  ;;  %v769_v4 = vmul.f32 %v2120_v12, %v737_v47  ;;  %1474 = vpow2.f32 %v924_v6  ;;  %v2188_v59 = vadd.f32 %v1661_v49, %v280_v63 }
 0x172   :  { %v1137_v25 = vadd.f32 1.0, %v1105_v57  ;;  %v626_v30 = vmul.f32 %v2163_v16, %v594_v61  ;;  %vm1057_vm6 = vcmp.ge.f32.partialorder %v2058_v10, 0.0  ;;  %v436_v14 = vmul.f32 0.3275911, %v2182_v17 }
 0x173   :  { %v801_v62 = vadd.f32 0.2548296, %v769_v4  ;;  %v1120_v36 = vsel %vm1056_vm5, %v1024_v19, %v1088_v0  ;;  %v956_v48 = vmul.f32 1.442695, %v898_v26  ;;  %v2197_v31 = vmul.f32 0.70710677, %v2188_v59  ;;  %v1467_v18 = vpop.eup %1466 }
 0x174   :  { %v1169_v7 = vmul.f32 %v1137_v25, %v337_v27  ;;  %v658_v23 = vadd.f32 1.4214138, %v626_v30  ;;  %v883_v27 = vmul.f32 %v851_v8, %v2143_v21  ;;  %v468_v56 = vadd.f32 1.0, %v436_v14 }
 0x175   :  { %v833_v54 = vmul.f32 %v2120_v12, %v801_v62  ;;  %v867_v22 = vsub.f32 0.0, %v2158_v9  ;;  %v2203_v1 = vand.u32 2147483647, %v2197_v31  ;;  %v194_v12 = vadd.f32 %v193_v5, %v1658_v45 }
 0x176   :  { %v1354_v2 = vpack.c.bf16 %v1169_v7, %v1168_v24  ;;  %v690_v50 = vmul.f32 %v2163_v16, %v658_v23  ;;  %v1152_v19 = vadd.f32 1.0, %v1120_v36  ;;  %1476 = vrcp.f32 %v468_v56 }
 0x177   :  { %v993_v11 = vmul.f32 %v1467_v18, %v833_v54  ;;  %v234_v40 = vadd.f32 %v233_v34, %v1658_v45  ;;  %v2207_v29 = vpop.eup %1468  ;;  %1478 = vpow2.f32 %v956_v48  ;;  %v452_v21 = vmul.f32 0.3275911, %v2203_v1 }
 0x178   :  { %1292 = vst [vmem:[#allocation2 + $0x20] sm:$0xff] %v1354_v2  ;;  %v722_v60 = vadd.f32 -0.28449672, %v690_v50  ;;  %v265_v15 = vmul.f32 %v1664_v51, %v194_v12  ;;  %v578_v0 = vmul.f32 1.0614054, %v2207_v29  ;;  %v899_v26 = vmul.f32 %v867_v22, %v2158_v9  ;;  %v195_v2 = vpop.f32.mrf.mxu0 }
 0x179   :  { %v1025_v53 = vsub.f32 1.0, %v993_v11  ;;  %v926_v52 = vmul.f32 1.442695, %v883_v27  ;;  %v281_v47 = vmul.f32 %v1664_v51, %v234_v40  ;;  %v2214_v6 = vpop.eup %1470  ;;  %v484_v13 = vadd.f32 1.0, %v452_v21 }
 0x17a   :  { %v754_v20 = vmul.f32 %v2163_v16, %v722_v60  ;;  %v2218_v57 = vadd.f32 %v1670_v58, %v265_v15  ;;  %v610_v8 = vadd.f32 -1.4531521, %v578_v0  ;;  %v563_v63 = vmul.f32 1.0614054, %v2214_v6 }
 0x17b   :  { %v1089_v61 = vsub.f32 0.0, %v1025_v53  ;;  %v2222_v25 = vadd.f32 %v1670_v58, %v281_v47  ;;  %v2227_v62 = vmul.f32 0.5, %v2106_v38  ;;  %v852_v24 = vsub.f32 0.0, %v2182_v17 }
 0x17c   :  { %v786_v4 = vadd.f32 0.2548296, %v754_v20  ;;  %1480 = vrcp.f32 %v484_v13  ;;  %v642_v23 = vmul.f32 %v2207_v29, %v610_v8  ;;  %v595_v14 = vadd.f32 -1.4531521, %v563_v63 }
 0x17d   :  { %v1121_v30 = vsel %vm1057_vm6, %v1025_v53, %v1089_v61  ;;  %v2232_v5 = vpop.eup %1472  ;;  %v1184_v36 = vmul.f32 %v1152_v19, %v2130_v43  ;;  %1482 = vpow2.f32 %v926_v52  ;;  %v958_v54 = vmul.f32 1.442695, %v899_v26 }
 0x17e   :  { %v1153_v9 = vadd.f32 1.0, %v1121_v30  ;;  %v818_v7 = vmul.f32 %v2163_v16, %v786_v4  ;;  %v2236_v10 = vmul.f32 0.70710677, %v2218_v57  ;;  %v1475_v38 = vpop.eup %1474  ;;  %v674_v34 = vadd.f32 1.4214138, %v642_v23 }
 0x17f   :  { %v627_v18 = vmul.f32 %v2214_v6, %v595_v14  ;;  %v2241_v16 = vmul.f32 0.70710677, %v2222_v25  ;;  %v579_v27 = vmul.f32 1.0614054, %v2232_v5  ;;  %v884_v43 = vmul.f32 %v852_v24, %v2182_v17 }
 0x180   :  { %v1185_v48 = vmul.f32 %v1153_v9, %v2166_v32  ;;  %v978_v50 = vmul.f32 %v1475_v38, %v818_v7  ;;  %v405_v56 = vand.u32 2147483647, %v2236_v10  ;;  %v706_v22 = vmul.f32 %v2207_v29, %v674_v34 }
 0x181   :  { %v2248_v12 = vmul.f32 0.5, %v2118_v39  ;;  %v659_v32 = vadd.f32 1.4214138, %v627_v18  ;;  %v611_v19 = vadd.f32 -1.4531521, %v579_v27  ;;  %v868_v60 = vsub.f32 0.0, %v2203_v1 }
 0x182   :  { %v1362_v11 = vpack.c.bf16 %v1185_v48, %v1184_v36  ;;  %v437_v40 = vmul.f32 0.3275911, %v405_v56  ;;  %v196_v53 = vadd.f32 %v195_v2, %v1651_v42  ;;  %vm1042_vm7 = vcmp.ge.f32.partialorder %v2086_v35, 0.0 }
 0x183   :  { %v738_v21 = vadd.f32 -0.28449672, %v706_v22  ;;  %v691_v17 = vmul.f32 %v2214_v6, %v659_v32  ;;  %1484 = vpow2.f32 %v958_v54  ;;  %v2255_v15 = vand.u32 2147483647, %v2241_v16  ;;  %v2257_v20 = vpop.eup %1476 }
 0x184   :  { %1300 = vst [vmem:[#allocation2 + $0x60] sm:$0xff] %v1362_v11  ;;  %v1010_v39 = vsub.f32 1.0, %v978_v50  ;;  %v643_v0 = vmul.f32 %v2232_v5, %v611_v19  ;;  %v928_v52 = vmul.f32 1.442695, %v884_v43  ;;  %v469_v47 = vadd.f32 1.0, %v437_v40  ;;  %v1479_v61 = vpop.eup %1478  ;;  %v235_v19 = vpop.f32.mrf.mxu1 }
 0x185   :  { %v770_v26 = vmul.f32 %v2207_v29, %v738_v21  ;;  %v723_v13 = vadd.f32 -0.28449672, %v691_v17  ;;  %v2262_v4 = vmul.f32 0.5, %v2136_v46  ;;  %v564_v8 = vmul.f32 1.0614054, %v2257_v20 }
 0x186   :  { %v675_v63 = vadd.f32 1.4214138, %v643_v0  ;;  %v900_v30 = vmul.f32 %v868_v60, %v2203_v1  ;;  %1486 = vrcp.f32 %v469_v47  ;;  %v266_v24 = vmul.f32 %v1656_v44, %v196_v53 }
 0x187   :  { %v802_v9 = vadd.f32 0.2548296, %v770_v26  ;;  %v755_v7 = vmul.f32 %v2214_v6, %v723_v13  ;;  %v596_v23 = vadd.f32 -1.4531521, %v564_v8  ;;  %v453_v14 = vmul.f32 0.3275911, %v2255_v15 }
 0x188   :  { %v1074_v36 = vsub.f32 0.0, %v1010_v39  ;;  %v707_v54 = vmul.f32 %v2232_v5, %v675_v63  ;;  %1488 = vpow2.f32 %v928_v52  ;;  %v853_v46 = vsub.f32 0.0, %v405_v56 }
 0x189   :  { %v2270_v38 = vpop.eup %1480  ;;  %v834_v48 = vmul.f32 %v2207_v29, %v802_v9  ;;  %v787_v34 = vadd.f32 0.2548296, %v755_v7  ;;  %v628_v1 = vmul.f32 %v2257_v20, %v596_v23  ;;  %v485_v18 = vadd.f32 1.0, %v453_v14 }
 0x18a   :  { %vm1058_vm8 = vcmp.ge.f32.partialorder %v2115_v3, 0.0  ;;  %vm1043_vm9 = vcmp.ge.f32.partialorder %v2133_v37, 0.0  ;;  %v739_v2 = vadd.f32 -0.28449672, %v707_v54  ;;  %v580_v50 = vmul.f32 1.0614054, %v2270_v38  ;;  %v1483_v11 = vpop.eup %1482  ;;  %v197_v3 = vpop.f32.mrf.mxu0 }
 0x18b   :  { %v960_v27 = vmul.f32 1.442695, %v900_v30  ;;  %v2278_v43 = vadd.f32 %v1661_v49, %v266_v24  ;;  %v994_v22 = vmul.f32 %v1479_v61, %v834_v48  ;;  %v819_v32 = vmul.f32 %v2214_v6, %v787_v34 }
 0x18c   :  { %v660_v29 = vadd.f32 1.4214138, %v628_v1  ;;  %1490 = vrcp.f32 %v485_v18  ;;  %v1106_v60 = vsel %vm1042_vm7, %v1010_v39, %v1074_v36  ;;  %v771_v40 = vmul.f32 %v2232_v5, %v739_v2 }
 0x18d   :  { %v612_v53 = vadd.f32 -1.4531521, %v580_v50  ;;  %v885_v21 = vmul.f32 %v853_v46, %v405_v56  ;;  %v1026_v17 = vsub.f32 1.0, %v994_v22  ;;  %v979_v0 = vmul.f32 %v1483_v11, %v819_v32 }
 0x18e   :  { %v692_v52 = vmul.f32 %v2257_v20, %v660_v29  ;;  %v2286_v47 = vmul.f32 0.70710677, %v2278_v43  ;;  %v803_v61 = vadd.f32 0.2548296, %v771_v40  ;;  %v869_v26 = vsub.f32 0.0, %v2255_v15 }
 0x18f   :  { %v644_v6 = vmul.f32 %v2270_v38, %v612_v53  ;;  %v236_v13 = vadd.f32 %v235_v19, %v1651_v42  ;;  %v1090_v35 = vsub.f32 0.0, %v1026_v17  ;;  %v1011_v39 = vsub.f32 1.0, %v979_v0 }
 0x190   :  { %v724_v8 = vadd.f32 -0.28449672, %v692_v52  ;;  %v2292_v63 = vand.u32 2147483647, %v2286_v47  ;;  %v1485_v56 = vpop.eup %1484  ;;  %v835_v30 = vmul.f32 %v2232_v5, %v803_v61  ;;  %1492 = vpow2.f32 %v960_v27 }
 0x191   :  { %v676_v24 = vadd.f32 1.4214138, %v644_v6  ;;  %v282_v9 = vmul.f32 %v1656_v44, %v236_v13  ;;  %v1138_v7 = vadd.f32 1.0, %v1106_v60  ;;  %v1075_v23 = vsub.f32 0.0, %v1011_v39 }
 0x192   :  { %v756_v14 = vmul.f32 %v2257_v20, %v724_v8  ;;  %v438_v36 = vmul.f32 0.3275911, %v2292_v63  ;;  %v995_v42 = vmul.f32 %v1485_v56, %v835_v30  ;;  %v930_v46 = vmul.f32 1.442695, %v885_v21 }
 0x193   :  { %v708_v54 = vmul.f32 %v2270_v38, %v676_v24  ;;  %v901_v48 = vmul.f32 %v869_v26, %v2255_v15  ;;  %v2300_v34 = vpop.eup %1486  ;;  %v1122_v5 = vsel %vm1058_vm8, %v1026_v17, %v1090_v35  ;;  %v1107_v44 = vsel %vm1043_vm9, %v1011_v39, %v1075_v23  ;;  %v237_v24 = vpop.f32.mrf.mxu1 }
 0x194   :  { %v470_v1 = vadd.f32 1.0, %v438_v36  ;;  %v2307_v18 = vadd.f32 %v1661_v49, %v282_v9  ;;  %v1139_v2 = vadd.f32 1.0, %v1107_v44  ;;  %v1027_v50 = vsub.f32 1.0, %v995_v42 }
 0x195   :  { %v788_v27 = vadd.f32 0.2548296, %v756_v14  ;;  %v740_v11 = vadd.f32 -0.28449672, %v708_v54  ;;  %v1489_v22 = vpop.eup %1488  ;;  %v1170_v32 = vmul.f32 %v1138_v7, %v2185_v28  ;;  %vm1059_vm10 = vcmp.ge.f32.partialorder %v2153_v55, 0.0 }
 0x196   :  { %v565_v15 = vmul.f32 1.0614054, %v2300_v34  ;;  %1494 = vrcp.f32 %v470_v1  ;;  %v1171_v37 = vmul.f32 %v1139_v2, %v2248_v12  ;;  %v1091_v29 = vsub.f32 0.0, %v1027_v50 }
 0x197   :  { %v772_v19 = vmul.f32 %v2270_v38, %v740_v11  ;;  %v962_v49 = vmul.f32 1.442695, %v901_v48  ;;  %v1154_v60 = vadd.f32 1.0, %v1122_v5  ;;  %1496 = vpow2.f32 %v930_v46 }
 0x198   :  { %v597_v40 = vadd.f32 -1.4531521, %v565_v15  ;;  %v2315_v53 = vmul.f32 0.70710677, %v2307_v18  ;;  %v1355_v28 = vpack.c.bf16 %v1171_v37, %v1170_v32  ;;  %v1123_v55 = vsel %vm1059_vm10, %v1027_v50, %v1091_v29 }
 0x199   :  { %v2317_v21 = vpop.eup %1490  ;;  %v820_v17 = vmul.f32 %v2257_v20, %v788_v27  ;;  %v198_v0 = vadd.f32 %v197_v3, %v1658_v45  ;;  %v1155_v52 = vadd.f32 1.0, %v1123_v55  ;;  %v804_v12 = vadd.f32 0.2548296, %v772_v19 }
 0x19a   :  { %v629_v61 = vmul.f32 %v2300_v34, %v597_v40  ;;  %v581_v6 = vmul.f32 1.0614054, %v2317_v21  ;;  %1293 = vst [vmem:[#allocation2 + $0x28] sm:$0xff] %v1355_v28  ;;  %v2324_v26 = vand.u32 2147483647, %v2315_v53  ;;  %v1186_v13 = vmul.f32 %v1154_v60, %v2227_v62 }
 0x19b   :  { %v1187_v35 = vmul.f32 %v1155_v52, %v2262_v4  ;;  %v980_v56 = vmul.f32 %v1489_v22, %v820_v17  ;;  %1498 = vpow2.f32 %v962_v49  ;;  %v267_v30 = vmul.f32 %v1664_v51, %v198_v0 }
 0x19c   :  { %v661_v39 = vadd.f32 1.4214138, %v629_v61  ;;  %v613_v8 = vadd.f32 -1.4531521, %v581_v6  ;;  %v454_v20 = vmul.f32 0.3275911, %v2324_v26  ;;  %v836_v23 = vmul.f32 %v2270_v38, %v804_v12 }
 0x19d   :  { %v1493_v9 = vpop.eup %1492  ;;  %v1363_v7 = vpack.c.bf16 %v1187_v35, %v1186_v13  ;;  %v2334_v54 = vadd.f32 %v1670_v58, %v267_v30  ;;  %v238_v46 = vadd.f32 %v237_v24, %v1658_v45  ;;  %v1012_v48 = vsub.f32 1.0, %v980_v56 }
 0x19e   :  { %v693_v14 = vmul.f32 %v2300_v34, %v661_v39  ;;  %v645_v36 = vmul.f32 %v2317_v21, %v613_v8  ;;  %v486_v62 = vadd.f32 1.0, %v454_v20  ;;  %v996_v5 = vmul.f32 %v1493_v9, %v836_v23 }
 0x19f   :  { %1301 = vst [vmem:[#allocation2 + $0x68] sm:$0xff] %v1363_v7  ;;  %v2340_v1 = vmul.f32 0.70710677, %v2334_v54  ;;  %v283_v50 = vmul.f32 %v1664_v51, %v238_v46  ;;  %v1076_v32 = vsub.f32 0.0, %v1012_v48  ;;  %v340_v49 = vmul.f32 0.5, %v2161_v33 }
 0x1a0   :  { %v725_v4 = vadd.f32 -0.28449672, %v693_v14  ;;  %v677_v42 = vadd.f32 1.4214138, %v645_v36  ;;  %1500 = vrcp.f32 %v486_v62  ;;  %v1028_v37 = vsub.f32 1.0, %v996_v5 }
 0x1a1   :  { %v407_v15 = vand.u32 2147483647, %v2340_v1  ;;  %v2348_v3 = vadd.f32 %v1670_v58, %v283_v50  ;;  %v854_v51 = vsub.f32 0.0, %v2292_v63  ;;  %vm1044_vm11 = vcmp.ge.f32.partialorder %v2173_v41, 0.0 }
 0x1a2   :  { %v757_v44 = vmul.f32 %v2300_v34, %v725_v4  ;;  %v709_v38 = vmul.f32 %v2317_v21, %v677_v42  ;;  %v1108_v58 = vsel %vm1044_vm11, %v1012_v48, %v1076_v32  ;;  %vm1060_vm12 = vcmp.ge.f32.partialorder %v2197_v31, 0.0 }
 0x1a3   :  { %v2342_v2 = vpop.eup %1494  ;;  %v439_v40 = vmul.f32 0.3275911, %v407_v15  ;;  %v2356_v17 = vmul.f32 0.70710677, %v2348_v3  ;;  %v1092_v12 = vsub.f32 0.0, %v1028_v37  ;;  %v886_v41 = vmul.f32 %v854_v51, %v2292_v63 }
 0x1a4   :  { %v789_v27 = vadd.f32 0.2548296, %v757_v44  ;;  %v741_v11 = vadd.f32 -0.28449672, %v709_v38  ;;  %v1497_v22 = vpop.eup %1496  ;;  %v566_v45 = vmul.f32 1.0614054, %v2342_v2 }
 0x1a5   :  { %v471_v0 = vadd.f32 1.0, %v439_v40  ;;  %v423_v6 = vand.u32 2147483647, %v2356_v17  ;;  %v870_v35 = vsub.f32 0.0, %v2324_v26  ;;  %v1140_v39 = vadd.f32 1.0, %v1108_v58 }
 0x1a6   :  { %v821_v29 = vmul.f32 %v2300_v34, %v789_v27  ;;  %v773_v19 = vmul.f32 %v2317_v21, %v741_v11  ;;  %v598_v60 = vadd.f32 -1.4531521, %v566_v45  ;;  %v341_v30 = vmul.f32 0.5, %v2218_v57 }
 0x1a7   :  { %1502 = vrcp.f32 %v471_v0  ;;  %v455_v20 = vmul.f32 0.3275911, %v423_v6  ;;  %vm1045_vm13 = vcmp.ge.f32.partialorder %v2236_v10, 0.0  ;;  %vm1061_vm14 = vcmp.ge.f32.partialorder %v2241_v16, 0.0 }
 0x1a8   :  { %v981_v28 = vmul.f32 %v1497_v22, %v821_v29  ;;  %v805_v55 = vadd.f32 0.2548296, %v773_v19  ;;  %v630_v34 = vmul.f32 %v2342_v2, %v598_v60  ;;  %v1499_v52 = vpop.eup %1498  ;;  %v1124_v9 = vsel %vm1060_vm12, %v1028_v37, %v1092_v12 }
 0x1a9   :  { %v487_v23 = vadd.f32 1.0, %v455_v20  ;;  %v932_v36 = vmul.f32 1.442695, %v886_v41  ;;  %v902_v4 = vmul.f32 %v870_v35, %v2324_v26  ;;  %v1172_v42 = vmul.f32 %v1140_v39, %v340_v49 }
 0x1aa   :  { %v1013_v33 = vsub.f32 1.0, %v981_v28  ;;  %v837_v61 = vmul.f32 %v2317_v21, %v805_v55  ;;  %v662_v13 = vadd.f32 1.4214138, %v630_v34  ;;  %v855_v46 = vsub.f32 0.0, %v407_v15 }
 0x1ab   :  { %1504 = vrcp.f32 %v487_v23  ;;  %v1156_v10 = vadd.f32 1.0, %v1124_v9  ;;  %v356_v38 = vmul.f32 0.5, %v2188_v59  ;;  %v357_v31 = vmul.f32 0.5, %v2222_v25 }
 0x1ac   :  { %v1077_v8 = vsub.f32 0.0, %v1013_v33  ;;  %v997_v56 = vmul.f32 %v1499_v52, %v837_v61  ;;  %v694_v21 = vmul.f32 %v2342_v2, %v662_v13  ;;  %1506 = vpow2.f32 %v932_v36 }
 0x1ad   :  { %v1501_v24 = vpop.eup %1500  ;;  %v964_v26 = vmul.f32 1.442695, %v902_v4  ;;  %v887_v32 = vmul.f32 %v855_v46, %v407_v15  ;;  %v1188_v45 = vmul.f32 %v1156_v10, %v356_v38  ;;  %v871_v49 = vsub.f32 0.0, %v423_v6 }
 0x1ae   :  { %v1109_v63 = vsel %vm1045_vm13, %v1013_v33, %v1077_v8  ;;  %v1029_v7 = vsub.f32 1.0, %v997_v56  ;;  %v582_v62 = vmul.f32 1.0614054, %v1501_v24  ;;  %v726_v5 = vadd.f32 -0.28449672, %v694_v21 }
 0x1af   :  { %v1141_v14 = vadd.f32 1.0, %v1109_v63  ;;  %1508 = vpow2.f32 %v964_v26  ;;  %v934_v25 = vmul.f32 1.442695, %v887_v32  ;;  %v903_v55 = vmul.f32 %v871_v49, %v423_v6 }
 0x1b0   :  { %v1093_v57 = vsub.f32 0.0, %v1029_v7  ;;  %v614_v44 = vadd.f32 -1.4531521, %v582_v62  ;;  %v758_v29 = vmul.f32 %v2342_v2, %v726_v5  ;;  %vm1046_vm15 = vcmp.ge.f32.partialorder %v2286_v47, 0.0 }
 0x1b1   :  { %v1173_v48 = vmul.f32 %v1141_v14, %v341_v30  ;;  %1510 = vpow2.f32 %v934_v25  ;;  %v966_v61 = vmul.f32 1.442695, %v903_v55  ;;  %vm1047_vm0 = vcmp.ge.f32.partialorder %v2340_v1, 0.0 }
 0x1b2   :  { %v1125_v50 = vsel %vm1061_vm14, %v1029_v7, %v1093_v57  ;;  %v646_v22 = vmul.f32 %v1501_v24, %v614_v44  ;;  %v790_v16 = vadd.f32 0.2548296, %v758_v29  ;;  %vm1062_vm1 = vcmp.ge.f32.partialorder %v2315_v53, 0.0 }
 0x1b3   :  { %v1356_v27 = vpack.c.bf16 %v1173_v48, %v1172_v42  ;;  %v1157_v11 = vadd.f32 1.0, %v1125_v50  ;;  %1512 = vpow2.f32 %v966_v61  ;;  %v343_v32 = vmul.f32 0.5, %v2334_v54 }
 0x1b4   :  { %v678_v19 = vadd.f32 1.4214138, %v646_v22  ;;  %v1503_v51 = vpop.eup %1502  ;;  %v822_v0 = vmul.f32 %v2342_v2, %v790_v16  ;;  %vm1063_vm2 = vcmp.ge.f32.partialorder %v2356_v17, 0.0  ;;  %v358_v1 = vmul.f32 0.5, %v2307_v18 }
 0x1b5   :  { %1294 = vst [vmem:[#allocation2 + $0x30] sm:$0xff] %v1356_v27  ;;  %v1189_v37 = vmul.f32 %v1157_v11, %v357_v31  ;;  %v567_v28 = vmul.f32 1.0614054, %v1503_v51  ;;  %v342_v11 = vmul.f32 0.5, %v2278_v43  ;;  %v359_v43 = vmul.f32 0.5, %v2348_v3 }
 0x1b6   :  { %v710_v59 = vmul.f32 %v1501_v24, %v678_v19 }
 0x1b7   :  { %v1364_v60 = vpack.c.bf16 %v1189_v37, %v1188_v45  ;;  %v599_v34 = vadd.f32 -1.4531521, %v567_v28 }
 0x1b8   :  { %v742_v40 = vadd.f32 -0.28449672, %v710_v59  ;;  %v1505_v15 = vpop.eup %1504 }
 0x1b9   :  { %1302 = vst [vmem:[#allocation2 + $0x70] sm:$0xff] %v1364_v60  ;;  %v631_v52 = vmul.f32 %v1503_v51, %v599_v34  ;;  %v583_v33 = vmul.f32 1.0614054, %v1505_v15  ;;  %v1507_v41 = vpop.eup %1506 }
 0x1ba   :  { %v774_v58 = vmul.f32 %v1501_v24, %v742_v40  ;;  %v982_v39 = vmul.f32 %v1507_v41, %v822_v0 }
 0x1bb   :  { %v663_v13 = vadd.f32 1.4214138, %v631_v52  ;;  %v615_v35 = vadd.f32 -1.4531521, %v583_v33 }
 0x1bc   :  { %v806_v12 = vadd.f32 0.2548296, %v774_v58  ;;  %v1509_v21 = vpop.eup %1508  ;;  %v1014_v9 = vsub.f32 1.0, %v982_v39 }
 0x1bd   :  { %v695_v8 = vmul.f32 %v1503_v51, %v663_v13  ;;  %v647_v20 = vmul.f32 %v1505_v15, %v615_v35 }
 0x1be   :  { %v838_v56 = vmul.f32 %v1501_v24, %v806_v12  ;;  %v1078_v36 = vsub.f32 0.0, %v1014_v9  ;;  %v1511_v4 = vpop.eup %1510 }
 0x1bf   :  { %v727_v30 = vadd.f32 -0.28449672, %v695_v8  ;;  %v679_v6 = vadd.f32 1.4214138, %v647_v20 }
 0x1c0   :  { %v998_v7 = vmul.f32 %v1509_v21, %v838_v56  ;;  %v1110_v10 = vsel %vm1046_vm15, %v1014_v9, %v1078_v36  ;;  %v1513_v38 = vpop.eup %1512 }
 0x1c1   :  { %v759_v63 = vmul.f32 %v1503_v51, %v727_v30  ;;  %v711_v2 = vmul.f32 %v1505_v15, %v679_v6  ;;  %v1142_v50 = vadd.f32 1.0, %v1110_v10 }
 0x1c2   :  { %v1030_v42 = vsub.f32 1.0, %v998_v7 }
 0x1c3   :  { %v791_v23 = vadd.f32 0.2548296, %v759_v63  ;;  %v743_v14 = vadd.f32 -0.28449672, %v711_v2  ;;  %v1174_v37 = vmul.f32 %v1142_v50, %v342_v11 }
 0x1c4   :  { %v1094_v5 = vsub.f32 0.0, %v1030_v42 }
 0x1c5   :  { %v823_v62 = vmul.f32 %v1503_v51, %v791_v23  ;;  %v775_v57 = vmul.f32 %v1505_v15, %v743_v14 }
 0x1c6   :  { %v1126_v26 = vsel %vm1062_vm1, %v1030_v42, %v1094_v5 }
 0x1c7   :  { %v983_v46 = vmul.f32 %v1511_v4, %v823_v62  ;;  %v807_v24 = vadd.f32 0.2548296, %v775_v57  ;;  %v1158_v49 = vadd.f32 1.0, %v1126_v26 }
 0x1c9   :  { %v1015_v48 = vsub.f32 1.0, %v983_v46  ;;  %v839_v44 = vmul.f32 %v1505_v15, %v807_v24  ;;  %v1190_v53 = vmul.f32 %v1158_v49, %v358_v1 }
 0x1cb   :  { %v1079_v31 = vsub.f32 0.0, %v1015_v48  ;;  %v999_v27 = vmul.f32 %v1513_v38, %v839_v44 }
 0x1cd   :  { %v1111_v22 = vsel %vm1047_vm0, %v1015_v48, %v1079_v31  ;;  %v1031_v45 = vsub.f32 1.0, %v999_v27 }
 0x1ce   :  { %v1143_v47 = vadd.f32 1.0, %v1111_v22 }
 0x1cf   :  { %v1095_v19 = vsub.f32 0.0, %v1031_v45 }
 0x1d0   :  { %v1175_v29 = vmul.f32 %v1143_v47, %v343_v32 }
 0x1d1   :  { %v1127_v59 = vsel %vm1063_vm2, %v1031_v45, %v1095_v19 }
 0x1d2   :  { %v1357_v60 = vpack.c.bf16 %v1175_v29, %v1174_v37  ;;  %v1159_v51 = vadd.f32 1.0, %v1127_v59 }
 0x1d4   :  { %1295 = vst [vmem:[#allocation2 + $0x38] sm:$0xff] %v1357_v60  ;;  %v1191_v54 = vmul.f32 %v1159_v51, %v359_v43 }
 0x1d6   :  { %v1365_v25 = vpack.c.bf16 %v1191_v54, %v1190_v53 }
 0x1d8   :  { %1303 = vst [vmem:[#allocation2 + $0x78] sm:$0xff] %v1365_v25 }
 0x1d9   :  { %1525 = shalt.err (!%p1522_p4)
}
 0x1da   :  { %s1539_s15 = smov 128   ;;  %s1540_s16 = smov 8  }
 0x1db   :  { %1315 = dma.vmem_to_hbm [thread:$0]  %s1310_s3, 2048, %s2393_s5, [#allocation3], %s1539_s15, %s1539_s15, %s1540_s16  }
 0x1dc   :  { %1534 = dma.done.wait [#allocation3], 2048  }
 0x1dd   :  { %1535 = vsyncadd [#allocation3], 4294965248 }
 0x1de   :  { %1319 = vsyncpa [#allocation3], 1 }

</bundles_post_ra>
